<compile_context>
chip_gen: v6e
topology: v6e:2x2x1
jax: 0.10.0
libtpu: 0.0.40
codegen_flags: <defaults>
</compile_context>

<pallas_src>
import functools

import jax
import jax.numpy as jnp
from jax.experimental import pallas as pl
from jax.experimental.pallas import tpu as pltpu

_PRECISION = jax.lax.Precision.HIGHEST


def _round_up(x, m):
    return ((x + m - 1) // m) * m


def _mlp_euler_kernel(state_ref, action_ref,
                      w1s_ref, w1a_ref, w233_ref, b123_ref, w4_ref, b4_ref,
                      out_ref, *, n_euler_steps, precision):
    """One batch tile of the Euler-integrated 4-layer MLP (transposed layout)."""
    dot = functools.partial(jnp.dot, preferred_element_type=jnp.float32,
                            precision=precision)

    # ---- Parameter loads hoisted out of the (statically unrolled) loop ------
    w1s = w1s_ref[...]            # [H, S]
    w1a = w1a_ref[...]            # [H, A]
    w2 = w233_ref[0]              # [H, H]
    w3 = w233_ref[1]              # [H, H]
    w41s = w233_ref[2]            # [H, H]   (W4 @ W1s)^T, fused p-update weight
    b1 = b123_ref[0]              # [H, 1]
    b2 = b123_ref[1]              # [H, 1]
    b3 = b123_ref[2]              # [H, 1]
    b41s = b123_ref[3]            # [H, 1]   (b4 @ W1s)^T
    w4 = w4_ref[...]              # [S, H]
    b4 = b4_ref[...]              # [S, 1]

    mm = w1s.dtype                # matmul operand dtype (f32, or bf16 for big H)

    x0 = state_ref[...].astype(jnp.float32)      # [S, Nb]  (batch on lanes)
    act = action_ref[...]                        # [A, Nb]
    hdim = w2.shape[0]
    nb = x0.shape[1]

    # Hoisted lane-broadcasts (JAX does not CSE broadcast_in_dim per loop step).
    b2b = jnp.broadcast_to(b2, (hdim, nb))
    b3b = jnp.broadcast_to(b3, (hdim, nb))
    b41sb = jnp.broadcast_to(b41s, (hdim, nb))

    # Loop-invariant action projection (+ layer-1 bias), computed once.
    act_proj = dot(w1a, act.astype(mm)) + b1                 # [H, Nb]

    # Carried layer-1 preactivation of the current state.  Updated via the
    # fused (W4 @ W1s)^T weight so the per-step serial MXU chain is three
    # [H,*] matmuls instead of four lane-sparse (K=8 / N=8) ones.
    p = dot(w1s, x0.astype(mm)) + act_proj                   # [H, Nb]

    step = jnp.float32(1.0 / n_euler_steps)
    sum_h3 = None
    for s in range(n_euler_steps):                           # static unroll
        h = jnp.tanh(p)                                      # layer 1
        h = jnp.tanh(dot(w2, h.astype(mm)) + b2b)            # layer 2
        h = jnp.tanh(dot(w3, h.astype(mm)) + b3b)            # layer 3
        sum_h3 = h if sum_h3 is None else sum_h3 + h
        if s + 1 < n_euler_steps:
            # p_{s+1} = W1s^T @ x_{s+1} + act_proj
            #         = p_s + step * (W1s^T @ (W4^T @ h3_s + b4^T))
            p = p + step * (dot(w41s, h.astype(mm)) + b41sb)

    # next_state = state + step * sum_s (W4^T @ h3_s + b4^T)
    #            = state + step * W4^T @ (sum_s h3_s) + b4^T   (n * step == 1)
    out = x0 + step * dot(w4, sum_h3.astype(mm)) + b4        # [S, Nb]
    out_ref[...] = out.astype(out_ref.dtype)


def pack_params(params, matmul_dtype=None):
    """One-time parameter repacking (keep OUT of the per-step forward path)."""
    hidden_dim = params["w1s"].shape[1]
    if matmul_dtype is None:
        # bf16 weights only pay off for larger hidden sizes (halves VMEM/HBM
        # traffic, doubles MXU throughput); keep f32 for small/accurate cases.
        matmul_dtype = jnp.bfloat16 if hidden_dim >= 256 else jnp.float32

    w1s_t = params["w1s"].T                                   # [H, S]
    w1a_t = params["w1a"].T                                   # [H, A]
    w2_t = params["w2"].T                                     # [H, H]
    w3_t = params["w3"].T                                     # [H, H]
    w4_t = params["w4"].T                                     # [S, H]
    b4_c = params["b4"].T                                     # [S, 1]

    # Fused output->layer-1 weight/bias for the incremental preactivation:
    #   (W4 @ W1s)^T = W1s^T @ W4^T,   (b4 @ W1s)^T = W1s^T @ b4^T
    w41s_t = jnp.dot(w1s_t, w4_t, precision=_PRECISION)       # [H, H]
    b41s_c = jnp.dot(w1s_t, b4_c, precision=_PRECISION)       # [H, 1]

    return {
        "w1s_t": w1s_t.astype(matmul_dtype),
        "w1a_t": w1a_t.astype(matmul_dtype),
        "w233_t": jnp.stack([w2_t, w3_t, w41s_t]).astype(matmul_dtype),  # [3,H,H]
        "b_cols": jnp.stack([params["b1"].T, params["b2"].T,
                             params["b3"].T, b41s_c]).astype(jnp.float32),  # [4,H,1]
        "w4_t": w4_t.astype(matmul_dtype),                    # [S, H]
        "b4_c": b4_c.astype(jnp.float32),                     # [S, 1]
    }


def model_member_forward(state, action, packed, n_euler_steps=1):
    """Pallas implementation of ModelMember.forward.

    state:  [B, state_dim] f32,  action: [B, action_dim] f32
    packed: output of pack_params (call once, not per forward).
    """
    assert n_euler_steps >= 1
    B, state_dim = state.shape
    _, action_dim = action.shape
    hidden_dim = packed["w233_t"].shape[-1]

    # ---- Batch tiling (batch is the lane axis after the transpose) ----------
    #  * B < 256: a single full-array tile (problem is latency-bound; avoids
    #    padding and extra ~0.35us grid steps entirely),
    #  * B >= 256: >=2 tiles (engages v7x's 2nd TensorCore via the "parallel"
    #    grid axis) of up to ~2048 lanes, multiple of 128 so blocks satisfy
    #    the (8,128) rule and output stores stay unmasked / lane-dense.
    if B >= 256:
        num_tiles = max(2, -(-B // 2048))
        tile_b = _round_up(-(-B // num_tiles), 128)
    else:
        num_tiles = 1
        tile_b = B
    padded_b = num_tiles * tile_b

    # Transposed, lane-dense layout: state_dim/action_dim rows on sublanes,
    # batch on lanes.
    state_t = state.T
    action_t = action.T
    if padded_b != B:
        # TODO(synk): mask the last tile's store in-kernel instead of padding,
        # to avoid the extra HBM copy for very large ragged B.
        state_t = jnp.pad(state_t, ((0, 0), (0, padded_b - B)))
        action_t = jnp.pad(action_t, ((0, 0), (0, padded_b - B)))

    # v7x has 64 MiB VMEM (32 MiB scoped default): for large resident weights,
    # single-buffer the constant-index weight specs and raise the scoped limit.
    weight_arrays = (packed["w1s_t"], packed["w1a_t"], packed["w233_t"],
                     packed["w4_t"])
    weight_bytes = sum(a.size * a.dtype.itemsize for a in weight_arrays)
    big_weights = weight_bytes > (8 << 20)
    w_kwargs = {"pipeline_mode": pl.Buffered(1)} if big_weights else {}
    cp_kwargs = {"vmem_limit_bytes": 64 * 1024 * 1024} if big_weights else {}

    kernel = functools.partial(_mlp_euler_kernel,
                               n_euler_steps=n_euler_steps,
                               precision=_PRECISION)

    out_t = pl.pallas_call(
        kernel,
        out_shape=jax.ShapeDtypeStruct((state_dim, padded_b), state.dtype),
        grid=(num_tiles,),
        in_specs=[
            # Batch-tiled streams (double-buffered by the pipeliner).
            pl.BlockSpec((state_dim, tile_b), lambda i: (0, i)),
            pl.BlockSpec((action_dim, tile_b), lambda i: (0, i)),
            # Weights / biases: constant index_map => loaded once, VMEM-resident.
            pl.BlockSpec((hidden_dim, state_dim), lambda i: (0, 0), **w_kwargs),
            pl.BlockSpec((hidden_dim, action_dim), lambda i: (0, 0), **w_kwargs),
            pl.BlockSpec((3, hidden_dim, hidden_dim), lambda i: (0, 0, 0), **w_kwargs),
            pl.BlockSpec((4, hidden_dim, 1), lambda i: (0, 0, 0), **w_kwargs),
            pl.BlockSpec((state_dim, hidden_dim), lambda i: (0, 0), **w_kwargs),
            pl.BlockSpec((state_dim, 1), lambda i: (0, 0), **w_kwargs),
        ],
        out_specs=pl.BlockSpec((state_dim, tile_b), lambda i: (0, i)),
        compiler_params=pltpu.CompilerParams(
            dimension_semantics=("parallel",), **cp_kwargs),
    )(state_t, action_t, packed["w1s_t"], packed["w1a_t"], packed["w233_t"],
      packed["b_cols"], packed["w4_t"], packed["b4_c"])

    if padded_b != B:
        out_t = out_t[:, :B]
    return out_t.T


def init_params(key, state_dim, action_dim, hidden_dim):
    """Deterministic synthetic parameters (uniform, like PyTorch default init)."""
    ks = jax.random.split(key, 8)

    def lin(kw, kb, fan_in, fan_out):
        bound = 1.0 / jnp.sqrt(fan_in)
        w = jax.random.uniform(kw, (fan_in, fan_out), jnp.float32, -bound, bound)
        b = jax.random.uniform(kb, (1, fan_out), jnp.float32, -bound, bound)
        return w, b

    in_dim = state_dim + action_dim
    w1, b1 = lin(ks[0], ks[1], in_dim, hidden_dim)
    w2, b2 = lin(ks[2], ks[3], hidden_dim, hidden_dim)
    w3, b3 = lin(ks[4], ks[5], hidden_dim, hidden_dim)
    w4, b4 = lin(ks[6], ks[7], hidden_dim, state_dim)
    return {
        "w1s": w1[:state_dim], "w1a": w1[state_dim:], "b1": b1,
        "w2": w2, "b2": b2,
        "w3": w3, "b3": b3,
        "w4": w4, "b4": b4,
    }


def _reference_forward(state, action, params, n_euler_steps=1):
    """Pure-JAX reference mirroring the PyTorch module (cat + single Linear)."""
    w1 = jnp.concatenate([params["w1s"], params["w1a"]], axis=0)
    next_state = state
    state_action = jnp.concatenate([state, action], axis=-1)
    step_size = 1.0 / n_euler_steps
    for _ in range(n_euler_steps):
        h = jnp.tanh(jnp.dot(state_action, w1, precision=_PRECISION) + params["b1"])
        h = jnp.tanh(jnp.dot(h, params["w2"], precision=_PRECISION) + params["b2"])
        h = jnp.tanh(jnp.dot(h, params["w3"], precision=_PRECISION) + params["b3"])
        delta = jnp.dot(h, params["w4"], precision=_PRECISION) + params["b4"]
        next_state = step_size * delta + next_state
        state_action = jnp.concatenate([next_state, action], axis=-1)
    return next_state


if __name__ == "__main__":
    state_dim, action_dim, hidden_dim = 8, 4, 32
    n_euler_steps = 2

    key = jax.random.PRNGKey(0)
    k_state, k_action, k_params = jax.random.split(key, 3)
    params = init_params(k_params, state_dim, action_dim, hidden_dim)
    packed = pack_params(params)          # packed once, outside the forward path

    # --- small single-tile case (B=8) ---
    batch = 8
    state = jax.random.normal(k_state, (batch, state_dim), jnp.float32)
    action = jax.random.normal(k_action, (batch, action_dim), jnp.float32)
    out = model_member_forward(state, action, packed, n_euler_steps=n_euler_steps)
    out = jax.block_until_ready(out)
    ref = _reference_forward(state, action, params, n_euler_steps=n_euler_steps)
    assert out.shape == (batch, state_dim)
    err = float(jnp.max(jnp.abs(out - ref)))
    assert jnp.allclose(out, ref, atol=1e-4, rtol=1e-4), f"mismatch (max|d|={err})"

    # --- multi-tile case (B=300): 2 parallel tiles of 256 lanes + padding ---
    batch2 = 300
    state2 = jax.random.normal(jax.random.PRNGKey(1), (batch2, state_dim), jnp.float32)
    action2 = jax.random.normal(jax.random.PRNGKey(2), (batch2, action_dim), jnp.float32)
    out2 = model_member_forward(state2, action2, packed, n_euler_steps=n_euler_steps)
    out2 = jax.block_until_ready(out2)
    ref2 = _reference_forward(state2, action2, params, n_euler_steps=n_euler_steps)
    assert out2.shape == (batch2, state_dim)
    err2 = float(jnp.max(jnp.abs(out2 - ref2)))
    assert jnp.allclose(out2, ref2, atol=1e-4, rtol=1e-4), f"mismatch (max|d|={err2})"

    print("KERNEL_OK")
</pallas_src>

<mosaic_0001>
module attributes {stable_mosaic.version = 11 : i64} {
  func.func @_mlp_euler_kernel(%arg0: i32, %arg1: memref<8x8xf32, #tpu.memory_space<vmem>>, %arg2: memref<4x8xf32, #tpu.memory_space<vmem>>, %arg3: memref<32x8xf32, #tpu.memory_space<vmem>>, %arg4: memref<32x4xf32, #tpu.memory_space<vmem>>, %arg5: memref<3x32x32xf32, #tpu.memory_space<vmem>>, %arg6: memref<4x32x1xf32, #tpu.memory_space<vmem>>, %arg7: memref<8x32xf32, #tpu.memory_space<vmem>>, %arg8: memref<8x1xf32, #tpu.memory_space<vmem>>, %arg9: memref<8x8xf32, #tpu.memory_space<vmem>>) attributes {dimension_semantics = [#tpu.dimension_semantics<parallel>], iteration_bounds = array<i64: 1>, scalar_prefetch = 0 : i64, scratch_operands = 0 : i64, tpu.core_type = #tpu.core_type<tc>, window_params = [{transform_indices = @transform_0, window_bounds = array<i64: 8, 8>}, {transform_indices = @transform_1, window_bounds = array<i64: 4, 8>}, {pipeline_mode = #tpu.pipeline_mode<synchronous>, transform_indices = @transform_2, window_bounds = array<i64: 32, 8>}, {pipeline_mode = #tpu.pipeline_mode<synchronous>, transform_indices = @transform_3, window_bounds = array<i64: 32, 4>}, {pipeline_mode = #tpu.pipeline_mode<synchronous>, transform_indices = @transform_4, window_bounds = array<i64: 3, 32, 32>}, {pipeline_mode = #tpu.pipeline_mode<synchronous>, transform_indices = @transform_5, window_bounds = array<i64: 4, 32, 1>}, {pipeline_mode = #tpu.pipeline_mode<synchronous>, transform_indices = @transform_6, window_bounds = array<i64: 8, 32>}, {pipeline_mode = #tpu.pipeline_mode<synchronous>, transform_indices = @transform_7, window_bounds = array<i64: 8, 1>}, {transform_indices = @transform_8, window_bounds = array<i64: 8, 8>}]} {
    %c0 = arith.constant 0 : index
    %c0_0 = arith.constant 0 : index
    %0 = vector.load %arg3[%c0, %c0_0] : memref<32x8xf32, #tpu.memory_space<vmem>>, vector<32x8xf32>
    %c0_1 = arith.constant 0 : index
    %c0_2 = arith.constant 0 : index
    %1 = vector.load %arg4[%c0_1, %c0_2] : memref<32x4xf32, #tpu.memory_space<vmem>>, vector<32x4xf32>
    %c0_3 = arith.constant 0 : index
    %c0_4 = arith.constant 0 : index
    %c0_5 = arith.constant 0 : index
    %2 = vector.load %arg5[%c0_3, %c0_4, %c0_5] : memref<3x32x32xf32, #tpu.memory_space<vmem>>, vector<1x32x32xf32>
    %3 = vector.shape_cast %2 : vector<1x32x32xf32> to vector<32x32xf32>
    %c1 = arith.constant 1 : index
    %c0_6 = arith.constant 0 : index
    %c0_7 = arith.constant 0 : index
    %4 = vector.load %arg5[%c1, %c0_6, %c0_7] : memref<3x32x32xf32, #tpu.memory_space<vmem>>, vector<1x32x32xf32>
    %5 = vector.shape_cast %4 : vector<1x32x32xf32> to vector<32x32xf32>
    %c2 = arith.constant 2 : index
    %c0_8 = arith.constant 0 : index
    %c0_9 = arith.constant 0 : index
    %6 = vector.load %arg5[%c2, %c0_8, %c0_9] : memref<3x32x32xf32, #tpu.memory_space<vmem>>, vector<1x32x32xf32>
    %7 = vector.shape_cast %6 : vector<1x32x32xf32> to vector<32x32xf32>
    %c0_10 = arith.constant 0 : index
    %c0_11 = arith.constant 0 : index
    %c0_12 = arith.constant 0 : index
    %8 = vector.load %arg6[%c0_10, %c0_11, %c0_12] : memref<4x32x1xf32, #tpu.memory_space<vmem>>, vector<1x32x1xf32>
    %9 = vector.shape_cast %8 : vector<1x32x1xf32> to vector<32x1xf32>
    %c1_13 = arith.constant 1 : index
    %c0_14 = arith.constant 0 : index
    %c0_15 = arith.constant 0 : index
    %10 = vector.load %arg6[%c1_13, %c0_14, %c0_15] : memref<4x32x1xf32, #tpu.memory_space<vmem>>, vector<1x32x1xf32>
    %11 = vector.shape_cast %10 : vector<1x32x1xf32> to vector<32x1xf32>
    %c2_16 = arith.constant 2 : index
    %c0_17 = arith.constant 0 : index
    %c0_18 = arith.constant 0 : index
    %12 = vector.load %arg6[%c2_16, %c0_17, %c0_18] : memref<4x32x1xf32, #tpu.memory_space<vmem>>, vector<1x32x1xf32>
    %13 = vector.shape_cast %12 : vector<1x32x1xf32> to vector<32x1xf32>
    %c3 = arith.constant 3 : index
    %c0_19 = arith.constant 0 : index
    %c0_20 = arith.constant 0 : index
    %14 = vector.load %arg6[%c3, %c0_19, %c0_20] : memref<4x32x1xf32, #tpu.memory_space<vmem>>, vector<1x32x1xf32>
    %15 = vector.shape_cast %14 : vector<1x32x1xf32> to vector<32x1xf32>
    %c0_21 = arith.constant 0 : index
    %c0_22 = arith.constant 0 : index
    %16 = vector.load %arg7[%c0_21, %c0_22] : memref<8x32xf32, #tpu.memory_space<vmem>>, vector<8x32xf32>
    %c0_23 = arith.constant 0 : index
    %c0_24 = arith.constant 0 : index
    %17 = vector.load %arg8[%c0_23, %c0_24] : memref<8x1xf32, #tpu.memory_space<vmem>>, vector<8x1xf32>
    %c0_25 = arith.constant 0 : index
    %c0_26 = arith.constant 0 : index
    %18 = vector.load %arg1[%c0_25, %c0_26] : memref<8x8xf32, #tpu.memory_space<vmem>>, vector<8x8xf32>
    %c0_27 = arith.constant 0 : index
    %c0_28 = arith.constant 0 : index
    %19 = vector.load %arg2[%c0_27, %c0_28] : memref<4x8xf32, #tpu.memory_space<vmem>>, vector<4x8xf32>
    %20 = vector.shape_cast %11 : vector<32x1xf32> to vector<32x1xf32>
    %21 = vector.broadcast %20 : vector<32x1xf32> to vector<32x8xf32>
    %22 = vector.shape_cast %13 : vector<32x1xf32> to vector<32x1xf32>
    %23 = vector.broadcast %22 : vector<32x1xf32> to vector<32x8xf32>
    %24 = vector.shape_cast %15 : vector<32x1xf32> to vector<32x1xf32>
    %25 = vector.broadcast %24 : vector<32x1xf32> to vector<32x8xf32>
    %cst = arith.constant dense<0.000000e+00> : vector<32x8xf32>
    %26 = tpu.matmul %1, %19, %cst {dimension_numbers = #tpu.dot_dimension_numbers<[1], [0], [0], [1], [0, 0, 1, 1], [], []>, precision = #tpu.contract_precision<fp32>} : vector<32x4xf32>, vector<4x8xf32>, vector<32x8xf32> -> vector<32x8xf32>
    %27 = vector.broadcast %9 : vector<32x1xf32> to vector<32x8xf32>
    %28 = arith.addf %26, %27 : vector<32x8xf32>
    %cst_29 = arith.constant dense<0.000000e+00> : vector<32x8xf32>
    %29 = tpu.matmul %0, %18, %cst_29 {dimension_numbers = #tpu.dot_dimension_numbers<[1], [0], [0], [1], [0, 0, 1, 1], [], []>, precision = #tpu.contract_precision<fp32>} : vector<32x8xf32>, vector<8x8xf32>, vector<32x8xf32> -> vector<32x8xf32>
    %30 = arith.addf %29, %28 : vector<32x8xf32>
    %31 = math.tanh %30 : vector<32x8xf32>
    %cst_30 = arith.constant dense<0.000000e+00> : vector<32x8xf32>
    %32 = tpu.matmul %3, %31, %cst_30 {dimension_numbers = #tpu.dot_dimension_numbers<[1], [0], [0], [1], [0, 0, 1, 1], [], []>, precision = #tpu.contract_precision<fp32>} : vector<32x32xf32>, vector<32x8xf32>, vector<32x8xf32> -> vector<32x8xf32>
    %33 = arith.addf %32, %21 : vector<32x8xf32>
    %34 = math.tanh %33 : vector<32x8xf32>
    %cst_31 = arith.constant dense<0.000000e+00> : vector<32x8xf32>
    %35 = tpu.matmul %5, %34, %cst_31 {dimension_numbers = #tpu.dot_dimension_numbers<[1], [0], [0], [1], [0, 0, 1, 1], [], []>, precision = #tpu.contract_precision<fp32>} : vector<32x32xf32>, vector<32x8xf32>, vector<32x8xf32> -> vector<32x8xf32>
    %36 = arith.addf %35, %23 : vector<32x8xf32>
    %37 = math.tanh %36 : vector<32x8xf32>
    %cst_32 = arith.constant dense<0.000000e+00> : vector<32x8xf32>
    %38 = tpu.matmul %7, %37, %cst_32 {dimension_numbers = #tpu.dot_dimension_numbers<[1], [0], [0], [1], [0, 0, 1, 1], [], []>, precision = #tpu.contract_precision<fp32>} : vector<32x32xf32>, vector<32x8xf32>, vector<32x8xf32> -> vector<32x8xf32>
    %39 = arith.addf %38, %25 : vector<32x8xf32>
    %cst_33 = arith.constant 5.000000e-01 : f32
    %40 = vector.broadcast %cst_33 : f32 to vector<32x8xf32>
    %41 = arith.mulf %40, %39 : vector<32x8xf32>
    %42 = arith.addf %30, %41 : vector<32x8xf32>
    %43 = math.tanh %42 : vector<32x8xf32>
    %cst_34 = arith.constant dense<0.000000e+00> : vector<32x8xf32>
    %44 = tpu.matmul %3, %43, %cst_34 {dimension_numbers = #tpu.dot_dimension_numbers<[1], [0], [0], [1], [0, 0, 1, 1], [], []>, precision = #tpu.contract_precision<fp32>} : vector<32x32xf32>, vector<32x8xf32>, vector<32x8xf32> -> vector<32x8xf32>
    %45 = arith.addf %44, %21 : vector<32x8xf32>
    %46 = math.tanh %45 : vector<32x8xf32>
    %cst_35 = arith.constant dense<0.000000e+00> : vector<32x8xf32>
    %47 = tpu.matmul %5, %46, %cst_35 {dimension_numbers = #tpu.dot_dimension_numbers<[1], [0], [0], [1], [0, 0, 1, 1], [], []>, precision = #tpu.contract_precision<fp32>} : vector<32x32xf32>, vector<32x8xf32>, vector<32x8xf32> -> vector<32x8xf32>
    %48 = arith.addf %47, %23 : vector<32x8xf32>
    %49 = math.tanh %48 : vector<32x8xf32>
    %50 = arith.addf %37, %49 : vector<32x8xf32>
    %cst_36 = arith.constant dense<0.000000e+00> : vector<8x8xf32>
    %51 = tpu.matmul %16, %50, %cst_36 {dimension_numbers = #tpu.dot_dimension_numbers<[1], [0], [0], [1], [0, 0, 1, 1], [], []>, precision = #tpu.contract_precision<fp32>} : vector<8x32xf32>, vector<32x8xf32>, vector<8x8xf32> -> vector<8x8xf32>
    %cst_37 = arith.constant 5.000000e-01 : f32
    %52 = vector.broadcast %cst_37 : f32 to vector<8x8xf32>
    %53 = arith.mulf %52, %51 : vector<8x8xf32>
    %54 = arith.addf %18, %53 : vector<8x8xf32>
    %55 = vector.broadcast %17 : vector<8x1xf32> to vector<8x8xf32>
    %56 = arith.addf %54, %55 : vector<8x8xf32>
    %c0_38 = arith.constant 0 : index
    %c0_39 = arith.constant 0 : index
    %57 = vector.load %arg9[%c0_38, %c0_39] : memref<8x8xf32, #tpu.memory_space<vmem>>, vector<8x8xf32>
    tpu.vector_store %arg9[%c0_38, %c0_39], %56 {strides = array<i32>} : memref<8x8xf32, #tpu.memory_space<vmem>>, vector<8x8xf32>,
    return
  }
  func.func @transform_0(%arg0: i32) -> (i32, i32) {
    %c0_i32 = arith.constant 0 : i32
    %c0_i32_0 = arith.constant 0 : i32
    return %c0_i32, %arg0 : i32, i32
  }
  func.func @transform_1(%arg0: i32) -> (i32, i32) {
    %c0_i32 = arith.constant 0 : i32
    %c0_i32_0 = arith.constant 0 : i32
    return %c0_i32, %arg0 : i32, i32
  }
  func.func @transform_2(%arg0: i32) -> (i32, i32) {
    %c0_i32 = arith.constant 0 : i32
    %c0_i32_0 = arith.constant 0 : i32
    %c0_i32_1 = arith.constant 0 : i32
    return %c0_i32, %c0_i32_0 : i32, i32
  }
  func.func @transform_3(%arg0: i32) -> (i32, i32) {
    %c0_i32 = arith.constant 0 : i32
    %c0_i32_0 = arith.constant 0 : i32
    %c0_i32_1 = arith.constant 0 : i32
    return %c0_i32, %c0_i32_0 : i32, i32
  }
  func.func @transform_4(%arg0: i32) -> (i32, i32, i32) {
    %c0_i32 = arith.constant 0 : i32
    %c0_i32_0 = arith.constant 0 : i32
    %c0_i32_1 = arith.constant 0 : i32
    %c0_i32_2 = arith.constant 0 : i32
    return %c0_i32, %c0_i32_0, %c0_i32_1 : i32, i32, i32
  }
  func.func @transform_5(%arg0: i32) -> (i32, i32, i32) {
    %c0_i32 = arith.constant 0 : i32
    %c0_i32_0 = arith.constant 0 : i32
    %c0_i32_1 = arith.constant 0 : i32
    %c0_i32_2 = arith.constant 0 : i32
    return %c0_i32, %c0_i32_0, %c0_i32_1 : i32, i32, i32
  }
  func.func @transform_6(%arg0: i32) -> (i32, i32) {
    %c0_i32 = arith.constant 0 : i32
    %c0_i32_0 = arith.constant 0 : i32
    %c0_i32_1 = arith.constant 0 : i32
    return %c0_i32, %c0_i32_0 : i32, i32
  }
  func.func @transform_7(%arg0: i32) -> (i32, i32) {
    %c0_i32 = arith.constant 0 : i32
    %c0_i32_0 = arith.constant 0 : i32
    %c0_i32_1 = arith.constant 0 : i32
    return %c0_i32, %c0_i32_0 : i32, i32
  }
  func.func @transform_8(%arg0: i32) -> (i32, i32) {
    %c0_i32 = arith.constant 0 : i32
    %c0_i32_0 = arith.constant 0 : i32
    return %c0_i32, %arg0 : i32, i32
  }
}

</mosaic_0001>

<bundles_post_ra>
// kernel: tpu_custom_call.1
= control target key start
LH: loop header
LB: loop body
LE: loop exit
PB: predicated region body
PF: predicated region fallthrough
CT: control target
= control target key end

     0   :  { %vm168_vm0 = vcmask 1043456   ;;  %vm155_vm1 = vcmask 31744   ;;  %vm747_vm2 = vcmask 64512   ;;  %s6873_s0 = inlined_call_operand.vmem [shape: f32[8,8], index: 0, kind: input, shape index: {}]   ;;  %s6874_s1 = inlined_call_operand.vmem [shape: f32[4,8], index: 1, kind: input, shape index: {}]   ;;  %s6875_s2 = inlined_call_operand.vmem [shape: f32[32,8], index: 2, kind: input, shape index: {}]   ;;  %s6876_s3 = inlined_call_operand.vmem [shape: f32[32,4], index: 3, kind: input, shape index: {}]   ;;  %s6877_s4 = inlined_call_operand.vmem [shape: f32[3,32,32], index: 4, kind: input, shape index: {}]   ;;  %s6878_s5 = inlined_call_operand.vmem [shape: f32[4,32,1], index: 5, kind: input, shape index: {}]   ;;  %s6879_s6 = inlined_call_operand.vmem [shape: f32[8,32], index: 6, kind: input, shape index: {}]   ;;  %s6880_s7 = inlined_call_operand.vmem [shape: f32[8,1], index: 7, kind: input, shape index: {}]   ;;  %s6881_s8 = inlined_call_operand.hbm [shape: f32[8,8], index: 8, kind: output, shape index: {}]  }
   0x1   :  { %v74_v0 = vld [vmem:[%s6874_s1] sm:$0xf]  ;;  %v35_v2 = vld [vmem:[%s6876_s3 + $0x8] sm:$0xff]  ;;  %v36_v6 = vld [vmem:[%s6876_s3 + $0x10] sm:$0xff] }
   0x2   :  { %v34_v1 = vld [vmem:[%s6876_s3] sm:$0xff]  ;;  %v170_v3 = vsel %vm168_vm0, %v74_v0, 0  ;;  %v160_v5 = vsel %vm155_vm1, %v35_v2, 0  ;;  %v37_v7 = vld [vmem:[%s6876_s3 + $0x18] sm:$0xff]  ;;  %v163_v11 = vsel %vm155_vm1, %v36_v6, 0 }
   0x3   :  { %v157_v4 = vsel %vm155_vm1, %v34_v1, 0  ;;  %v6062_v8 = vand.u32 4294901760, %v170_v3  ;;  %v6066_v10 = vand.u32 4294901760, %v160_v5  ;;  %v73_v12 = vld [vmem:[%s6873_s0] sm:$0xff]  ;;  %v6071_v13 = vand.u32 4294901760, %v163_v11 }
   0x4   :  { %v6064_v9 = vand.u32 4294901760, %v157_v4  ;;  %v166_v14 = vsel %vm155_vm1, %v37_v7, 0  ;;  %v6086_v20 = vand.u32 4294901760, %v73_v12  ;;  %v30_v30 = vld [vmem:[%s6875_s2] sm:$0xff] }
   0x5   :  { %5339 = vmatprep.subr.mxu0 %v6062_v8  ;;  %v310_v16 = vsub.f32 %v170_v3, %v6062_v8  ;;  %v6077_v17 = vsub.f32 %v160_v5, %v6066_v10  ;;  %v6080_v18 = vand.u32 4294901760, %v166_v14  ;;  %v6084_v19 = vsub.f32 %v163_v11, %v6071_v13 }
   0x6   :  { %v239_v15 = vsub.f32 %v157_v4, %v6064_v9  ;;  %5349 = vmatprep.mubr.f32.mxu1 %v6064_v9  ;;  %5340 = vmatpush3.msra.mxu0 %v6062_v8  ;;  %v6100_v32 = vsub.f32 %v73_v12, %v6086_v20 }
   0x7   :  { %v311_v22 = vand.u32 4294901760, %v310_v16  ;;  %v250_v23 = vand.u32 4294901760, %v6077_v17  ;;  %5355 = vmatprep.subr.mxu0 %v310_v16  ;;  %v6090_v24 = vsub.f32 %v166_v14, %v6080_v18  ;;  %v260_v25 = vand.u32 4294901760, %v6084_v19 }
   0x8   :  { %v240_v21 = vand.u32 4294901760, %v239_v15 }
   0x9   :  { %v312_v27 = vsub.f32 %v310_v16, %v311_v22  ;;  %v251_v28 = vsub.f32 %v6077_v17, %v250_v23  ;;  %v270_v29 = vand.u32 4294901760, %v6090_v24  ;;  %v261_v31 = vsub.f32 %v6084_v19, %v260_v25 }
   0xa   :  { %v241_v26 = vsub.f32 %v239_v15, %v240_v21 }
   0xb   :  { %v313_v34 = vand.u32 4294901760, %v312_v27  ;;  %v252_v35 = vand.u32 4294901760, %v251_v28  ;;  %v271_v36 = vsub.f32 %v6090_v24, %v270_v29 }
   0xc   :  { %v242_v33 = vand.u32 4294901760, %v241_v26 }
   0xd   :  { %13 = vsyncpa [#allocation3], 0  ;;  %v262_v37 = vand.u32 4294901760, %v261_v31  ;;  %v749_v38 = vsel %vm747_vm2, %v30_v30, 0  ;;  %v31_v39 = vld [vmem:[%s6875_s2 + $0x8] sm:$0xff]  ;;  %5347 = vmatprep.subr.mxu1 %v313_v34  ;;  %v272_v40 = vand.u32 4294901760, %v271_v36 }
   0xe   :  { %5341 = vmatprep.mubr.f32.mxu0 %v242_v33  ;;  %5348 = vmatpush3.msra.mxu1 %v313_v34  ;;  %v6108_v41 = vand.u32 4294901760, %v6100_v32  ;;  %v32_v42 = vld [vmem:[%s6875_s2 + $0x10] sm:$0xff]  ;;  %v6114_v43 = vand.u32 4294901760, %v749_v38  ;;  %v752_v44 = vsel %vm747_vm2, %v31_v39, 0  ;;  %v33_v45 = vld [vmem:[%s6875_s2 + $0x18] sm:$0xff]  ;;  %v5998_v53 = vmov 0  }
   0xf   :  { %5342 = vmatmul.mubr.f32.vlgmr.msra.gmra.mxu0 %v252_v35  ;;  %5350 = vmatmul.mubr.f32.vlgmr.msra.gmra.mxu1 %v6066_v10  ;;  %v755_v46 = vsel %vm747_vm2, %v32_v42, 0  ;;  %v6126_v48 = vand.u32 4294901760, %v752_v44  ;;  %v758_v50 = vsel %vm747_vm2, %v33_v45, 0  ;;  %v55_v51 = vld [vmem:[%s6878_s5 + $0x18] sm:$0xff]  ;;  %v54_v59 = vld [vmem:[%s6878_s5 + $0x10] sm:$0xff]  ;;  %v53_v62 = vld [vmem:[%s6878_s5 + $0x8] sm:$0xff] }
  0x10   :  { %5356 = vmatpush3.msra.mxu0 %v310_v16  ;;  %5363 = vmatprep.subr.mxu1 %v6062_v8  ;;  %v900_v47 = vsub.f32 %v6100_v32, %v6108_v41  ;;  %v6130_v49 = vsub.f32 %v749_v38, %v6114_v43  ;;  %v6137_v52 = vand.u32 4294901760, %v755_v46  ;;  %v6143_v56 = vand.u32 4294901760, %v758_v50  ;;  %v5000_v5 = vld [vmem:[%s6878_s5 + $0x38] sm:$0xff]  ;;  %v4998_v11 = vld [vmem:[%s6878_s5 + $0x28] sm:$0xff]  ;;  %v4999_v12 = vld [vmem:[%s6878_s5 + $0x30] sm:$0xff] }
  0x11   :  { %5344 = vmatprep.mubr.f32.mxu0 %v262_v37  ;;  %5364 = vmatpush3.msra.mxu1 %v6062_v8  ;;  %v6141_v55 = vsub.f32 %v752_v44, %v6126_v48  ;;  %v4997_v14 = vld [vmem:[%s6878_s5 + $0x20] sm:$0xff]  ;;  %v5003_v16 = vld [vmem:[%s6878_s5 + $0x50] sm:$0xff]  ;;  %vm1339_vm3 = vcmask 261120   ;;  %vm6000_vm4 = vmmov 0  }
  0x12   :  { %5352 = vmatprep.mubr.f32.mxu1 %v6071_v13  ;;  %5371 = vmatprep.subr.mxu0 %v311_v22  ;;  %v901_v54 = vand.u32 4294901760, %v900_v47  ;;  %v828_v57 = vand.u32 4294901760, %v6130_v49  ;;  %v6149_v58 = vsub.f32 %v755_v46, %v6137_v52  ;;  %v857_v61 = vsub.f32 %v758_v50, %v6143_v56 }
  0x13   :  { %5345 = vmatmul.mubr.f32.gmra.mxu0 %v272_v40  ;;  %5353 = vmatmul.mubr.f32.gmra.mxu1 %v6080_v18  ;;  %v838_v60 = vand.u32 4294901760, %v6141_v55 }
  0x14   :  { %5357 = vmatprep.mubr.f32.mxu0 %v239_v15  ;;  %5365 = vmatprep.mubr.f32.mxu1 %v240_v21  ;;  %v829_v63 = vsub.f32 %v6130_v49, %v828_v57  ;;  %v848_v0 = vand.u32 4294901760, %v6149_v58  ;;  %v858_v2 = vand.u32 4294901760, %v857_v61  ;;  %v5002_v15 = vld [vmem:[%s6878_s5 + $0x48] sm:$0xff]  ;;  %v72_v21 = vld [vmem:[%s6880_s7] sm:$0xff] }
  0x15   :  { %5379 = vmatprep.subr.mxu1 %v6062_v8  ;;  %5925 = vset.pattern.permute.xlu0 %v5998_v53  ;;  %v839_v1 = vsub.f32 %v6141_v55, %v838_v60 }
  0x16   :  { %5926 = vset.pattern.permute.xlu1 %v5998_v53  ;;  %152 = vperm.xlu0 %5925, %v55_v51   ;;  %v830_v3 = vand.u32 4294901760, %v829_v63  ;;  %v849_v4 = vsub.f32 %v6149_v58, %v848_v0  ;;  %v859_v7 = vsub.f32 %v857_v61, %v858_v2 }
  0x17   :  { %5358 = vmatmul.mubr.f32.vlgmr.msra.gmra.mxu0 %v6077_v17  ;;  %5366 = vmatmul.mubr.f32.vlgmr.msra.gmra.mxu1 %v250_v23  ;;  %v840_v6 = vand.u32 4294901760, %v839_v1  ;;  %v5008_v17 = vld [vmem:[%s6878_s5 + $0x78] sm:$0xff]  ;;  %v38_v23 = vld [vmem:[%s6877_s4] sm:$0xff] }
  0x18   :  { %5372 = vmatpush3.msra.mxu0 %v311_v22  ;;  %5360 = vmatprep.mubr.f32.mxu0 %v6084_v19  ;;  %v5006_v19 = vld [vmem:[%s6878_s5 + $0x68] sm:$0xff]  ;;  %v5005_v22 = vld [vmem:[%s6878_s5 + $0x60] sm:$0xff] }
  0x19   :  { %5380 = vmatpush3.msra.mxu1 %v6062_v8  ;;  %5368 = vmatprep.mubr.f32.mxu1 %v260_v25  ;;  %v52_v8 = vld [vmem:[%s6878_s5] sm:$0xff] }
  0x1a   :  { %5387 = vmatprep.subr.mxu0 %v6086_v20  ;;  %5395 = vmatprep.subr.mxu1 %v901_v54 }
  0x1b   :  { %5361 = vmatmul.mubr.f32.gmra.mxu0 %v6090_v24  ;;  %5369 = vmatmul.mubr.f32.gmra.mxu1 %v270_v29  ;;  %v1341_v24 = vsel %vm1339_vm3, %v38_v23, 0 }
  0x1c   :  { %5373 = vmatprep.mubr.f32.mxu0 %v6064_v9  ;;  %5381 = vmatprep.mubr.f32.mxu1 %v6064_v9  ;;  %v850_v9 = vand.u32 4294901760, %v849_v4  ;;  %v6243_v25 = vand.u32 4294901760, %v1341_v24 }
  0x1d   :  { %147 = vperm.xlu0 %5925, %v54_v59   ;;  %142 = vperm.xlu1 %5926, %v53_v62  }
  0x1e   :  { %v6246_v26 = vsub.f32 %v1341_v24, %v6243_v25 }
  0x1f   :  { %5374 = vmatmul.mubr.f32.vlgmr.msra.gmra.mxu0 %v6066_v10  ;;  %5382 = vmatmul.mubr.f32.vlgmr.msra.gmra.mxu1 %v6066_v10  ;;  %v860_v10 = vand.u32 4294901760, %v859_v7 }
  0x20   :  { %5388 = vmatpush3.msra.mxu0 %v6086_v20  ;;  %5376 = vmatprep.mubr.f32.mxu0 %v6071_v13  ;;  %v6250_v27 = vand.u32 4294901760, %v6246_v26 }
  0x21   :  { %5396 = vmatpush3.msra.mxu1 %v901_v54  ;;  %5384 = vmatprep.mubr.f32.mxu1 %v6071_v13  ;;  %v5004_v13 = vld [vmem:[%s6878_s5 + $0x58] sm:$0xff] }
  0x22   :  { %5403 = vmatprep.subr.mxu0 %v6100_v32  ;;  %5411 = vmatprep.subr.mxu1 %v6086_v20  ;;  %v1424_v28 = vsub.f32 %v6246_v26, %v6250_v27 }
  0x23   :  { %5377 = vmatmul.mubr.f32.gmra.mxu0 %v6080_v18  ;;  %5385 = vmatmul.mubr.f32.gmra.mxu1 %v6080_v18  ;;  %v5001_v18 = vld [vmem:[%s6878_s5 + $0x40] sm:$0xff] }
  0x24   :  { %5389 = vmatprep.mubr.f32.mxu0 %v830_v3  ;;  %5397 = vmatprep.mubr.f32.mxu1 %v6114_v43  ;;  %v6254_v29 = vand.u32 4294901760, %v1424_v28 }
  0x25   :  { %92 = vperm.xlu0 %5925, %v5000_v5   ;;  %137 = vperm.xlu1 %5926, %v52_v8  }
  0x27   :  { %5390 = vmatmul.mubr.f32.vlgmr.msra.gmra.mxu0 %v840_v6  ;;  %5398 = vmatmul.mubr.f32.vlgmr.msra.gmra.mxu1 %v6126_v48 }
  0x28   :  { %5404 = vmatpush3.msra.mxu0 %v6100_v32  ;;  %5392 = vmatprep.mubr.f32.mxu0 %v850_v9 }
  0x29   :  { %5412 = vmatpush3.msra.mxu1 %v6086_v20  ;;  %5400 = vmatprep.mubr.f32.mxu1 %v6137_v52 }
  0x2a   :  { %5419 = vmatprep.subr.mxu0 %v6108_v41  ;;  %5427 = vmatprep.subr.mxu1 %v6086_v20 }
  0x2b   :  { %5393 = vmatmul.mubr.f32.gmra.mxu0 %v860_v10  ;;  %5401 = vmatmul.mubr.f32.gmra.mxu1 %v6143_v56 }
  0x2c   :  { %5405 = vmatprep.mubr.f32.mxu0 %v6130_v49  ;;  %5413 = vmatprep.mubr.f32.mxu1 %v828_v57 }
  0x2d   :  { %82 = vperm.xlu0 %5925, %v4998_v11   ;;  %87 = vperm.xlu1 %5926, %v4999_v12  }
  0x2f   :  { %5406 = vmatmul.mubr.f32.vlgmr.msra.gmra.mxu0 %v6141_v55  ;;  %5414 = vmatmul.mubr.f32.vlgmr.msra.gmra.mxu1 %v838_v60 }
  0x30   :  { %5420 = vmatpush3.msra.mxu0 %v6108_v41  ;;  %5408 = vmatprep.mubr.f32.mxu0 %v6149_v58 }
  0x31   :  { %5428 = vmatpush3.msra.mxu1 %v6086_v20  ;;  %5416 = vmatprep.mubr.f32.mxu1 %v848_v0  ;;  %v5007_v20 = vld [vmem:[%s6878_s5 + $0x70] sm:$0xff] }
  0x32   :  { %112 = vperm.xlu0 %5925, %v5004_v13   ;;  %77 = vperm.xlu1 %5926, %v4997_v14  }
  0x33   :  { %5409 = vmatmul.mubr.f32.gmra.mxu0 %v857_v61  ;;  %5417 = vmatmul.mubr.f32.gmra.mxu1 %v858_v2 }
  0x34   :  { %5421 = vmatprep.mubr.f32.mxu0 %v6114_v43  ;;  %5429 = vmatprep.mubr.f32.mxu1 %v6114_v43 }
  0x36   :  { %102 = vperm.xlu0 %5925, %v5002_v15   ;;  %107 = vperm.xlu1 %5926, %v5003_v16  }
  0x37   :  { %5422 = vmatmul.mubr.f32.vlgmr.msra.gmra.mxu0 %v6126_v48  ;;  %5430 = vmatmul.mubr.f32.vlgmr.msra.gmra.mxu1 %v6126_v48 }
  0x38   :  { %5424 = vmatprep.mubr.f32.mxu0 %v6137_v52  ;;  %5432 = vmatprep.mubr.f32.mxu1 %v6137_v52 }
  0x3a   :  { %132 = vperm.xlu0 %5925, %v5008_v17   ;;  %97 = vperm.xlu1 %5926, %v5001_v18  }
  0x3b   :  { %5425 = vmatmul.mubr.f32.gmra.mxu0 %v6143_v56  ;;  %5433 = vmatmul.mubr.f32.gmra.mxu1 %v6143_v56 }
  0x3c   :  { %5457 = vmatprep.mubr.f32.mxu1 %v6243_v25  ;;  %5443 = vmatprep.mubr.f32.mxu0 %v6254_v29 }
  0x3e   :  { %122 = vperm.xlu0 %5925, %v5006_v19   ;;  %127 = vperm.xlu1 %5926, %v5007_v20  }
  0x42   :  { %4970 = vperm.xlu0 %5925, %v72_v21   ;;  %117 = vperm.xlu1 %5926, %v5005_v22  }
  0x91   :  { %v153_v40 = vpop.permute.xlu0 %152 }
  0x98   :  { %v143_v34 = vpop.permute.xlu1 %142  ;;  %v148_v53 = vpop.permute.xlu0 %147 }
  0xa0   :  { %v138_v42 = vpop.permute.xlu1 %137 }
  0xcf   :  { %v5343_v30 = vpop.f32.mrf.mxu0  ;;  %v5351_v31 = vpop.f32.mrf.mxu1 }
  0xd0   :  { %v255_v44 = vadd.f32 %v5343_v30, %v143_v34 }
  0xd1   :  { %v244_v32 = vpop.f32.mrf.mxu0  ;;  %v350_v33 = vpop.f32.mrf.mxu1 }
  0xd2   :  { %v245_v47 = vadd.f32 %v244_v32, %v138_v42  ;;  %v357_v50 = vadd.f32 %v5351_v31, %v255_v44 }
  0xd3   :  { %v5346_v35 = vpop.f32.mrf.mxu0  ;;  %v5354_v36 = vpop.f32.mrf.mxu1 }
  0xd4   :  { %v275_v51 = vadd.f32 %v5346_v35, %v153_v40  ;;  %v351_v55 = vadd.f32 %v350_v33, %v245_v47 }
  0xd5   :  { %v264_v37 = vpop.f32.mrf.mxu0  ;;  %v362_v38 = vpop.f32.mrf.mxu1 }
  0xd6   :  { %v265_v56 = vadd.f32 %v264_v37, %v148_v53  ;;  %v369_v60 = vadd.f32 %v5354_v36, %v275_v51 }
  0xd7   :  { %v5359_v39 = vpop.f32.mrf.mxu0  ;;  %v5367_v41 = vpop.f32.mrf.mxu1 }
  0xd8   :  { %v450_v57 = vadd.f32 %v5359_v39, %v357_v50  ;;  %v363_v0 = vadd.f32 %v362_v38, %v265_v56 }
  0xd9   :  { %v442_v43 = vpop.f32.mrf.mxu0  ;;  %v537_v45 = vpop.f32.mrf.mxu1 }
  0xda   :  { %v443_v61 = vadd.f32 %v442_v43, %v351_v55  ;;  %v546_v1 = vadd.f32 %v5367_v41, %v450_v57 }
  0xdb   :  { %v5362_v46 = vpop.f32.mrf.mxu0  ;;  %v5370_v48 = vpop.f32.mrf.mxu1 }
  0xdc   :  { %v464_v2 = vadd.f32 %v5362_v46, %v369_v60  ;;  %v538_v5 = vadd.f32 %v537_v45, %v443_v61 }
  0xdd   :  { %v456_v49 = vpop.f32.mrf.mxu0  ;;  %v553_v52 = vpop.f32.mrf.mxu1 }
  0xde   :  { %v457_v6 = vadd.f32 %v456_v49, %v363_v0  ;;  %v562_v10 = vadd.f32 %v5370_v48, %v464_v2 }
  0xdf   :  { %v5375_v54 = vpop.f32.mrf.mxu0  ;;  %v5383_v58 = vpop.f32.mrf.mxu1 }
  0xe0   :  { %v642_v7 = vadd.f32 %v5375_v54, %v546_v1  ;;  %v554_v14 = vadd.f32 %v553_v52, %v457_v6 }
  0xe1   :  { %v635_v59 = vpop.f32.mrf.mxu0  ;;  %v725_v62 = vpop.f32.mrf.mxu1 }
  0xe2   :  { %v636_v11 = vadd.f32 %v635_v59, %v538_v5  ;;  %v732_v15 = vadd.f32 %v5383_v58, %v642_v7  ;;  %v39_v5 = vld [vmem:[%s6877_s4 + $0x8] sm:$0xff] }
  0xe3   :  { %v5378_v63 = vpop.f32.mrf.mxu0  ;;  %v5386_v3 = vpop.f32.mrf.mxu1  ;;  %v1344_v7 = vsel %vm1339_vm3, %v39_v5, 0 }
  0xe4   :  { %v654_v16 = vadd.f32 %v5378_v63, %v562_v10  ;;  %v726_v19 = vadd.f32 %v725_v62, %v636_v11  ;;  %v6279_v10 = vand.u32 4294901760, %v1344_v7 }
  0xe5   :  { %v647_v4 = vpop.f32.mrf.mxu0  ;;  %v737_v8 = vpop.f32.mrf.mxu1 }
  0xe6   :  { %v648_v20 = vadd.f32 %v647_v4, %v554_v14  ;;  %v744_v24 = vadd.f32 %v5386_v3, %v654_v16  ;;  %v6286_v14 = vsub.f32 %v1344_v7, %v6279_v10  ;;  %v6393_v7 = vpop.permute.xlu0 %92 }
  0xe7   :  { %v5391_v9 = vpop.f32.mrf.mxu0  ;;  %v5399_v12 = vpop.f32.mrf.mxu1 }
  0xe8   :  { %v843_v21 = vadd.f32 %v5391_v9, %v732_v15  ;;  %v738_v32 = vadd.f32 %v737_v8, %v648_v20  ;;  %v40_v8 = vld [vmem:[%s6877_s4 + $0x10] sm:$0xff]  ;;  %v41_v9 = vld [vmem:[%s6877_s4 + $0x18] sm:$0xff]  ;;  %v6296_v20 = vand.u32 4294901760, %v6286_v14 }
  0xe9   :  { %v832_v13 = vpop.f32.mrf.mxu0  ;;  %v938_v17 = vpop.f32.mrf.mxu1  ;;  %v1347_v11 = vsel %vm1339_vm3, %v40_v8, 0 }
  0xea   :  { %v833_v28 = vadd.f32 %v832_v13, %v726_v19  ;;  %v945_v33 = vadd.f32 %v5399_v12, %v843_v21  ;;  %v1350_v12 = vsel %vm1339_vm3, %v41_v9, 0  ;;  %v6283_v13 = vand.u32 4294901760, %v1347_v11 }
  0xeb   :  { %v5394_v18 = vpop.f32.mrf.mxu0  ;;  %v5402_v22 = vpop.f32.mrf.mxu1  ;;  %v6288_v16 = vand.u32 4294901760, %v1350_v12 }
  0xec   :  { %v863_v34 = vadd.f32 %v5394_v18, %v744_v24  ;;  %v939_v37 = vadd.f32 %v938_v17, %v833_v28  ;;  %v6293_v19 = vsub.f32 %v1347_v11, %v6283_v13  ;;  %v6395_v11 = vpop.permute.xlu1 %87 }
  0xed   :  { %v852_v23 = vpop.f32.mrf.mxu0  ;;  %v950_v30 = vpop.f32.mrf.mxu1 }
  0xee   :  { %v853_v38 = vadd.f32 %v852_v23, %v738_v32  ;;  %v957_v42 = vadd.f32 %v5402_v22, %v863_v34  ;;  %v6301_v23 = vsub.f32 %v1350_v12, %v6288_v16 }
  0xef   :  { %v5407_v31 = vpop.f32.mrf.mxu0  ;;  %v5415_v35 = vpop.f32.mrf.mxu1 }
  0xf0   :  { %v1038_v39 = vadd.f32 %v5407_v31, %v945_v33  ;;  %v951_v46 = vadd.f32 %v950_v30, %v853_v38  ;;  %v6306_v30 = vand.u32 4294901760, %v6293_v19  ;;  %v1434_v33 = vsub.f32 %v6286_v14, %v6296_v20 }
  0xf1   :  { %v1030_v36 = vpop.f32.mrf.mxu0  ;;  %v1125_v40 = vpop.f32.mrf.mxu1 }
  0xf2   :  { %v1031_v43 = vadd.f32 %v1030_v36, %v939_v37  ;;  %v1134_v47 = vadd.f32 %v5415_v35, %v1038_v39  ;;  %v6317_v35 = vand.u32 4294901760, %v6301_v23  ;;  %v1444_v39 = vsub.f32 %v6293_v19, %v6306_v30 }
  0xf3   :  { %v5410_v41 = vpop.f32.mrf.mxu0  ;;  %v5418_v44 = vpop.f32.mrf.mxu1 }
  0xf4   :  { %v1052_v48 = vadd.f32 %v5410_v41, %v957_v42  ;;  %v1126_v51 = vadd.f32 %v1125_v40, %v1031_v43  ;;  %v6326_v41 = vand.u32 4294901760, %v1434_v33 }
  0xf5   :  { %v1044_v45 = vpop.f32.mrf.mxu0  ;;  %v1141_v49 = vpop.f32.mrf.mxu1 }
  0xf6   :  { %v1045_v52 = vadd.f32 %v1044_v45, %v951_v46  ;;  %v1150_v56 = vadd.f32 %v5418_v44, %v1052_v48  ;;  %v1454_v44 = vsub.f32 %v6301_v23, %v6317_v35  ;;  %v6333_v48 = vand.u32 4294901760, %v1444_v39 }
  0xf7   :  { %v5423_v50 = vpop.f32.mrf.mxu0  ;;  %v5431_v54 = vpop.f32.mrf.mxu1 }
  0xf8   :  { %v1230_v53 = vadd.f32 %v5423_v50, %v1134_v47  ;;  %v1142_v61 = vadd.f32 %v1141_v49, %v1045_v52 }
  0xf9   :  { %v1223_v55 = vpop.f32.mrf.mxu0  ;;  %v1313_v59 = vpop.f32.mrf.mxu1 }
  0xfa   :  { %v6257_v57 = vadd.f32 %v5431_v54, %v1230_v53  ;;  %v1224_v58 = vadd.f32 %v1223_v55, %v1126_v51  ;;  %v6336_v51 = vand.u32 4294901760, %v1454_v44  ;;  %v4989_v55 = vld [vmem:[%s6877_s4 + $0x20] sm:$0xff] }
  0xfb   :  { %v5426_v60 = vpop.f32.mrf.mxu0  ;;  %v5434_v0 = vpop.f32.mrf.mxu1 }
  0xfc   :  { %5927 = vtanh.f32 %v6257_v57  ;;  %v6260_v62 = vadd.f32 %v1313_v59, %v1224_v58  ;;  %v1242_v63 = vadd.f32 %v5426_v60, %v1150_v56  ;;  %v1971_v56 = vsel %vm1339_vm3, %v4989_v55, 0 }
  0xfd   :  { %v1235_v1 = vpop.f32.mrf.mxu0  ;;  %v1325_v4 = vpop.f32.mrf.mxu1  ;;  %v6379_v58 = vand.u32 4294901760, %v1971_v56 }
  0xfe   :  { %5929 = vtanh.f32 %v6260_v62  ;;  %v6263_v2 = vadd.f32 %v5434_v0, %v1242_v63  ;;  %v1236_v3 = vadd.f32 %v1235_v1, %v1142_v61 }
  0xff   :  { %v6382_v59 = vsub.f32 %v1971_v56, %v6379_v58 }
 0x100   :  { %5931 = vtanh.f32 %v6263_v2  ;;  %v6269_v6 = vadd.f32 %v1325_v4, %v1236_v3 }
 0x101   :  { %6904 = vst [vmem:[#allocation5_spill] sm:$0xff] %v6382_v59  ;;  %v6386_v60 = vand.u32 4294901760, %v6382_v59 }
 0x102   :  { %5933 = vtanh.f32 %v6269_v6 }
 0x103   :  { %6905 = vst [vmem:[#allocation6_spill] sm:$0xff] %v6386_v60  ;;  %v2054_v61 = vsub.f32 %v6382_v59, %v6386_v60 }
 0x105   :  { %v6390_v63 = vand.u32 4294901760, %v2054_v61 }
 0x109   :  { %v5928_v15 = vpop.eup %5927 }
 0x10a   :  { %v6290_v18 = vand.u32 4294901760, %v5928_v15 }
 0x10b   :  { %v5930_v17 = vpop.eup %5929 }
 0x10c   :  { %v6298_v22 = vand.u32 4294901760, %v5930_v17  ;;  %v1501_v31 = vsub.f32 %v5928_v15, %v6290_v18 }
 0x10d   :  { %v5932_v21 = vpop.eup %5931 }
 0x10e   :  { %v6303_v24 = vand.u32 4294901760, %v5932_v21  ;;  %v1508_v36 = vsub.f32 %v5930_v17, %v6298_v22  ;;  %v1502_v40 = vand.u32 4294901760, %v1501_v31  ;;  %v6397_v17 = vpop.permute.xlu0 %82 }
 0x10f   :  { %v5934_v28 = vpop.eup %5933 }
 0x110   :  { %v6309_v32 = vand.u32 4294901760, %v5934_v28  ;;  %5435 = vmatprep.subr.mxu0 %v6303_v24  ;;  %v1487_v34 = vsub.f32 %v5932_v21, %v6303_v24  ;;  %v1509_v45 = vand.u32 4294901760, %v1508_v36  ;;  %v1503_v49 = vsub.f32 %v1501_v31, %v1502_v40 }
 0x111   :  { %5436 = vmatpush3.msra.mxu0 %v6303_v24 }
 0x112   :  { %5437 = vmatprep.subr.mxu0 %v6309_v32  ;;  %v1488_v37 = vand.u32 4294901760, %v1487_v34  ;;  %v1494_v38 = vsub.f32 %v5934_v28, %v6309_v32  ;;  %v1510_v52 = vsub.f32 %v1508_v36, %v1509_v45  ;;  %v1504_v53 = vand.u32 4294901760, %v1503_v49 }
 0x113   :  { %5438 = vmatpush3.msra.mxu0 %v6309_v32 }
 0x114   :  { %5439 = vmatprep.subr.mxu0 %v6290_v18  ;;  %v1489_v42 = vsub.f32 %v1487_v34, %v1488_v37  ;;  %v1495_v43 = vand.u32 4294901760, %v1494_v38  ;;  %v1511_v54 = vand.u32 4294901760, %v1510_v52 }
 0x115   :  { %5440 = vmatpush3.msra.mxu0 %v6290_v18 }
 0x116   :  { %5441 = vmatprep.subr.mxu0 %v6298_v22  ;;  %v1490_v46 = vand.u32 4294901760, %v1489_v42  ;;  %v1496_v47 = vsub.f32 %v1494_v38, %v1495_v43 }
 0x117   :  { %5442 = vmatpush3.msra.mxu0 %v6298_v22 }
 0x118   :  { %5444 = vmatmul.mubr.f32.vlgmr.msra.gmra.mxu0 %v6326_v41  ;;  %5449 = vmatprep.subr.mxu1 %v1490_v46  ;;  %v1497_v50 = vand.u32 4294901760, %v1496_v47 }
 0x119   :  { %5463 = vmatprep.subr.mxu0 %v1487_v34  ;;  %5450 = vmatpush3.msra.mxu1 %v1490_v46 }
 0x11a   :  { %5464 = vmatpush3.msra.mxu0 %v1487_v34  ;;  %5451 = vmatprep.subr.mxu1 %v1497_v50 }
 0x11b   :  { %5465 = vmatprep.subr.mxu0 %v1494_v38  ;;  %5446 = vmatprep.mubr.f32.mxu0 %v6333_v48 }
 0x11c   :  { %5452 = vmatpush3.msra.mxu1 %v1497_v50  ;;  %5466 = vmatpush3.msra.mxu0 %v1494_v38 }
 0x11d   :  { %5447 = vmatmul.mubr.f32.gmra.mxu0 %v6336_v51  ;;  %5453 = vmatprep.subr.mxu1 %v1504_v53 }
 0x11e   :  { %5467 = vmatprep.subr.mxu0 %v1501_v31  ;;  %5454 = vmatpush3.msra.mxu1 %v1504_v53 }
 0x11f   :  { %5468 = vmatpush3.msra.mxu0 %v1501_v31  ;;  %5455 = vmatprep.subr.mxu1 %v1511_v54 }
 0x120   :  { %5469 = vmatprep.subr.mxu0 %v1508_v36  ;;  %5456 = vmatpush3.msra.mxu1 %v1511_v54 }
 0x121   :  { %5470 = vmatpush3.msra.mxu0 %v1508_v36  ;;  %5458 = vmatmul.mubr.f32.vlgmr.msra.gmra.mxu1 %v6279_v10 }
 0x122   :  { %5471 = vmatprep.mubr.f32.mxu0 %v6246_v26  ;;  %5477 = vmatprep.subr.mxu1 %v6303_v24 }
 0x123   :  { %5491 = vmatprep.subr.mxu0 %v1488_v37  ;;  %5472 = vmatmul.mubr.f32.vlgmr.msra.gmra.mxu0 %v6286_v14 }
 0x124   :  { %5478 = vmatpush3.msra.mxu1 %v6303_v24  ;;  %5492 = vmatpush3.msra.mxu0 %v1488_v37 }
 0x125   :  { %5479 = vmatprep.subr.mxu1 %v6309_v32  ;;  %5493 = vmatprep.subr.mxu0 %v1495_v43 }
 0x126   :  { %5460 = vmatprep.mubr.f32.mxu1 %v6283_v13  ;;  %5480 = vmatpush3.msra.mxu1 %v6309_v32 }
 0x127   :  { %5494 = vmatpush3.msra.mxu0 %v1495_v43  ;;  %5461 = vmatmul.mubr.f32.gmra.mxu1 %v6288_v16 }
 0x128   :  { %5481 = vmatprep.subr.mxu1 %v6290_v18  ;;  %5495 = vmatprep.subr.mxu0 %v1502_v40 }
 0x129   :  { %5474 = vmatprep.mubr.f32.mxu0 %v6293_v19  ;;  %5482 = vmatpush3.msra.mxu1 %v6290_v18 }
 0x12a   :  { %5496 = vmatpush3.msra.mxu0 %v1502_v40  ;;  %5483 = vmatprep.subr.mxu1 %v6298_v22 }
 0x12b   :  { %5475 = vmatmul.mubr.f32.gmra.mxu0 %v6301_v23  ;;  %5497 = vmatprep.subr.mxu0 %v1509_v45 }
 0x12c   :  { %5484 = vmatpush3.msra.mxu1 %v6298_v22  ;;  %5485 = vmatprep.mubr.f32.mxu1 %v6250_v27 }
 0x12d   :  { %5498 = vmatpush3.msra.mxu0 %v1509_v45  ;;  %5486 = vmatmul.mubr.f32.vlgmr.msra.gmra.mxu1 %v6296_v20 }
 0x12e   :  { %5505 = vmatprep.subr.mxu1 %v6303_v24  ;;  %5499 = vmatprep.mubr.f32.mxu0 %v6243_v25 }
 0x12f   :  { %5506 = vmatpush3.msra.mxu1 %v6303_v24  ;;  %5500 = vmatmul.mubr.f32.vlgmr.msra.gmra.mxu0 %v6279_v10 }
 0x130   :  { %5507 = vmatprep.subr.mxu1 %v6309_v32  ;;  %5488 = vmatprep.mubr.f32.mxu1 %v6306_v30 }
 0x131   :  { %5508 = vmatpush3.msra.mxu1 %v6309_v32  ;;  %5502 = vmatprep.mubr.f32.mxu0 %v6283_v13 }
 0x132   :  { %5489 = vmatmul.mubr.f32.gmra.mxu1 %v6317_v35  ;;  %5509 = vmatprep.subr.mxu1 %v6290_v18 }
 0x133   :  { %5510 = vmatpush3.msra.mxu1 %v6290_v18  ;;  %5503 = vmatmul.mubr.f32.gmra.mxu0 %v6288_v16 }
 0x134   :  { %5511 = vmatprep.subr.mxu1 %v6298_v22  ;;  %5513 = vmatprep.mubr.f32.mxu1 %v6243_v25 }
 0x135   :  { %5512 = vmatpush3.msra.mxu1 %v6298_v22  ;;  %5527 = vmatprep.mubr.f32.mxu0 %v6390_v63  ;;  %v6400_v22 = vpop.permute.xlu1 %77 }
 0x136   :  { %5514 = vmatmul.mubr.f32.vlgmr.msra.gmra.mxu1 %v6279_v10 }
 0x137   :  { %5516 = vmatprep.mubr.f32.mxu1 %v6283_v13 }
 0x13a   :  { %5517 = vmatmul.mubr.f32.gmra.mxu1 %v6288_v16 }
 0x13b   :  { %5541 = vmatprep.mubr.f32.mxu1 %v6379_v58 }
 0x1d8   :  { %v5445_v0 = vpop.f32.mrf.mxu0 }
 0x1d9   :  { %v1438_v18 = vadd.f32 %v5445_v0, %v6397_v17 }
 0x1da   :  { %v1427_v1 = vpop.f32.mrf.mxu0 }
 0x1db   :  { %v1428_v24 = vadd.f32 %v1427_v1, %v6400_v22 }
 0x1dd   :  { %v5448_v3 = vpop.f32.mrf.mxu0 }
 0x1de   :  { %v1458_v32 = vadd.f32 %v5448_v3, %v6393_v7 }
 0x1df   :  { %v1447_v4 = vpop.f32.mrf.mxu0 }
 0x1e0   :  { %v1448_v37 = vadd.f32 %v1447_v4, %v6395_v11 }
 0x1e1   :  { %v5459_v5 = vpop.f32.mrf.mxu1 }
 0x1e2   :  { %v1555_v28 = vadd.f32 %v5459_v5, %v1438_v18 }
 0x1e3   :  { %v1548_v8 = vpop.f32.mrf.mxu1  ;;  %v5473_v9 = vpop.f32.mrf.mxu0 }
 0x1e4   :  { %v1549_v33 = vadd.f32 %v1548_v8, %v1428_v24  ;;  %v1654_v38 = vadd.f32 %v5473_v9, %v1555_v28 }
 0x1e5   :  { %v1646_v15 = vpop.f32.mrf.mxu0 }
 0x1e6   :  { %v1647_v43 = vadd.f32 %v1646_v15, %v1549_v33  ;;  %v4992_v33 = vld [vmem:[%s6877_s4 + $0x38] sm:$0xff] }
 0x1e7   :  { %v5462_v12 = vpop.f32.mrf.mxu1 }
 0x1e8   :  { %v1567_v39 = vadd.f32 %v5462_v12, %v1458_v32  ;;  %v4991_v32 = vld [vmem:[%s6877_s4 + $0x30] sm:$0xff] }
 0x1e9   :  { %v1560_v21 = vpop.f32.mrf.mxu1 }
 0x1ea   :  { %v1561_v44 = vadd.f32 %v1560_v21, %v1448_v37  ;;  %v4990_v21 = vld [vmem:[%s6877_s4 + $0x28] sm:$0xff]  ;;  %v1980_v37 = vsel %vm1339_vm3, %v4992_v33, 0 }
 0x1eb   :  { %v5476_v31 = vpop.f32.mrf.mxu0 }
 0x1ec   :  { %v1668_v49 = vadd.f32 %v5476_v31, %v1567_v39  ;;  %v1974_v31 = vsel %vm1339_vm3, %v4990_v21, 0 }
 0x1ed   :  { %v1660_v34 = vpop.f32.mrf.mxu0  ;;  %v5487_v36 = vpop.f32.mrf.mxu1 }
 0x1ee   :  { %v1753_v45 = vadd.f32 %v5487_v36, %v1654_v38  ;;  %v1661_v54 = vadd.f32 %v1660_v34, %v1561_v44  ;;  %v6415_v34 = vand.u32 4294901760, %v1974_v31  ;;  %v1977_v36 = vsel %vm1339_vm3, %v4991_v32, 0 }
 0x1ef   :  { %v1744_v40 = vpop.f32.mrf.mxu1  ;;  %v5501_v42 = vpop.f32.mrf.mxu0  ;;  %v6419_v38 = vand.u32 4294901760, %v1977_v36 }
 0x1f0   :  { %v1745_v50 = vadd.f32 %v1744_v40, %v1647_v43  ;;  %v1858_v55 = vadd.f32 %v5501_v42, %v1753_v45  ;;  %v6422_v39 = vsub.f32 %v1974_v31, %v6415_v34  ;;  %v6424_v42 = vand.u32 4294901760, %v1980_v37 }
 0x1f1   :  { %v1851_v46 = vpop.f32.mrf.mxu0  ;;  %6906 = vst [vmem:[#allocation7_spill] sm:$0xff] %v6419_v38  ;;  %v6429_v45 = vsub.f32 %v1977_v36, %v6419_v38 }
 0x1f2   :  { %v5490_v47 = vpop.f32.mrf.mxu1  ;;  %v1852_v0 = vadd.f32 %v1851_v46, %v1745_v50  ;;  %6907 = vst [vmem:[#allocation8_spill] sm:$0xff] %v6422_v39  ;;  %6908 = vst [vmem:[#allocation9_spill] sm:$0xff] %v6424_v42  ;;  %v6432_v46 = vand.u32 4294901760, %v6422_v39  ;;  %v6437_v50 = vsub.f32 %v1980_v37, %v6424_v42 }
 0x1f3   :  { %v5504_v53 = vpop.f32.mrf.mxu0  ;;  %v1769_v56 = vadd.f32 %v5490_v47, %v1668_v49  ;;  %6909 = vst [vmem:[#allocation10_spill] sm:$0xff] %v6429_v45 }
 0x1f4   :  { %v1760_v52 = vpop.f32.mrf.mxu1  ;;  %6910 = vst [vmem:[#allocation11_spill] sm:$0xff] %v6432_v46  ;;  %6911 = vst [vmem:[#allocation12_spill] sm:$0xff] %v6437_v50 }
 0x1f5   :  { %v1761_v1 = vadd.f32 %v1760_v52, %v1661_v54  ;;  %v1863_v4 = vpop.f32.mrf.mxu0  ;;  %v1870_v8 = vadd.f32 %v5504_v53, %v1769_v56  ;;  %v6442_v54 = vand.u32 4294901760, %v6429_v45 }
 0x1f6   :  { %v5515_v61 = vpop.f32.mrf.mxu1 }
 0x1f7   :  { %v1951_v3 = vadd.f32 %v5515_v61, %v1858_v55  ;;  %v1864_v15 = vadd.f32 %v1863_v4, %v1761_v1  ;;  %6912 = vst [vmem:[#allocation13_spill] sm:$0xff] %v6442_v54  ;;  %v2064_v61 = vsub.f32 %v6422_v39, %v6432_v46  ;;  %v6453_v1 = vand.u32 4294901760, %v6437_v50 }
 0x1f8   :  { %v1944_v5 = vpop.f32.mrf.mxu1 }
 0x1f9   :  { %5935 = vtanh.f32 %v1951_v3  ;;  %v1945_v9 = vadd.f32 %v1944_v5, %v1852_v0  ;;  %6913 = vst [vmem:[#allocation14_spill] sm:$0xff] %v6453_v1  ;;  %v2084_v21 = vsub.f32 %v6437_v50, %v6453_v1 }
 0x1fa   :  { %v5518_v12 = vpop.f32.mrf.mxu1 }
 0x1fb   :  { %5937 = vtanh.f32 %v1945_v9  ;;  %v1963_v18 = vadd.f32 %v5518_v12, %v1870_v8  ;;  %v2074_v8 = vsub.f32 %v6429_v45, %v6442_v54  ;;  %v6462_v12 = vand.u32 4294901760, %v2064_v61 }
 0x1fc   :  { %v1956_v24 = vpop.f32.mrf.mxu1  ;;  %v6472_v37 = vand.u32 4294901760, %v2084_v21  ;;  %v6527_v21 = vpop.permute.xlu1 %107 }
 0x1fd   :  { %5939 = vtanh.f32 %v1963_v18  ;;  %v1957_v28 = vadd.f32 %v1956_v24, %v1864_v15  ;;  %v6469_v32 = vand.u32 4294901760, %v2074_v8 }
 0x1ff   :  { %5941 = vtanh.f32 %v1957_v28 }
 0x206   :  { %v5936_v40 = vpop.eup %5935 }
 0x207   :  { %v6426_v44 = vand.u32 4294901760, %v5936_v40 }
 0x208   :  { %v5938_v43 = vpop.eup %5937 }
 0x209   :  { %v6434_v49 = vand.u32 4294901760, %v5938_v43  ;;  %v2131_v55 = vsub.f32 %v5936_v40, %v6426_v44 }
 0x20a   :  { %v5940_v47 = vpop.eup %5939 }
 0x20b   :  { %v6439_v52 = vand.u32 4294901760, %v5940_v47  ;;  %v2138_v3 = vsub.f32 %v5938_v43, %v6434_v49  ;;  %v2132_v9 = vand.u32 4294901760, %v2131_v55 }
 0x20c   :  { %v5942_v53 = vpop.eup %5941 }
 0x20d   :  { %v6445_v56 = vand.u32 4294901760, %v5942_v53  ;;  %5519 = vmatprep.subr.mxu0 %v6439_v52  ;;  %v2117_v0 = vsub.f32 %v5940_v47, %v6439_v52  ;;  %v2139_v24 = vand.u32 4294901760, %v2138_v3  ;;  %v2133_v33 = vsub.f32 %v2131_v55, %v2132_v9 }
 0x20e   :  { %5520 = vmatpush3.msra.mxu0 %v6439_v52 }
 0x20f   :  { %5521 = vmatprep.subr.mxu0 %v6445_v56  ;;  %v2118_v4 = vand.u32 4294901760, %v2117_v0  ;;  %v2124_v5 = vsub.f32 %v5942_v53, %v6445_v56  ;;  %v2140_v40 = vsub.f32 %v2138_v3, %v2139_v24  ;;  %v2134_v43 = vand.u32 4294901760, %v2133_v33 }
 0x210   :  { %5522 = vmatpush3.msra.mxu0 %v6445_v56 }
 0x211   :  { %5523 = vmatprep.subr.mxu0 %v6426_v44  ;;  %v2119_v15 = vsub.f32 %v2117_v0, %v2118_v4  ;;  %v2125_v18 = vand.u32 4294901760, %v2124_v5  ;;  %v2141_v47 = vand.u32 4294901760, %v2140_v40  ;;  %v6532_v40 = vpop.permute.xlu1 %97 }
 0x212   :  { %5524 = vmatpush3.msra.mxu0 %v6426_v44  ;;  %6916 = vst [vmem:[#allocation17_spill] sm:$0xff] %v6532_v40 }
 0x213   :  { %5525 = vmatprep.subr.mxu0 %v6434_v49  ;;  %v2120_v28 = vand.u32 4294901760, %v2119_v15  ;;  %v2126_v31 = vsub.f32 %v2124_v5, %v2125_v18 }
 0x214   :  { %5526 = vmatpush3.msra.mxu0 %v6434_v49 }
 0x215   :  { %5528 = vmatmul.mubr.f32.vlgmr.msra.gmra.mxu0 %v6462_v12  ;;  %5533 = vmatprep.subr.mxu1 %v2120_v28  ;;  %v2127_v36 = vand.u32 4294901760, %v2126_v31 }
 0x216   :  { %5547 = vmatprep.subr.mxu0 %v2117_v0  ;;  %5534 = vmatpush3.msra.mxu1 %v2120_v28 }
 0x217   :  { %5548 = vmatpush3.msra.mxu0 %v2117_v0  ;;  %5535 = vmatprep.subr.mxu1 %v2127_v36 }
 0x218   :  { %5549 = vmatprep.subr.mxu0 %v2124_v5  ;;  %5530 = vmatprep.mubr.f32.mxu0 %v6469_v32 }
 0x219   :  { %5536 = vmatpush3.msra.mxu1 %v2127_v36  ;;  %5550 = vmatpush3.msra.mxu0 %v2124_v5 }
 0x21a   :  { %5531 = vmatmul.mubr.f32.gmra.mxu0 %v6472_v37  ;;  %5537 = vmatprep.subr.mxu1 %v2134_v43 }
 0x21b   :  { %5551 = vmatprep.subr.mxu0 %v2131_v55  ;;  %5538 = vmatpush3.msra.mxu1 %v2134_v43 }
 0x21c   :  { %5552 = vmatpush3.msra.mxu0 %v2131_v55  ;;  %5539 = vmatprep.subr.mxu1 %v2141_v47 }
 0x21d   :  { %5553 = vmatprep.subr.mxu0 %v2138_v3  ;;  %5540 = vmatpush3.msra.mxu1 %v2141_v47 }
 0x21e   :  { %5554 = vmatpush3.msra.mxu0 %v2138_v3  ;;  %5542 = vmatmul.mubr.f32.vlgmr.msra.gmra.mxu1 %v6415_v34 }
 0x21f   :  { %5555 = vmatprep.mubr.f32.mxu0 %v6382_v59  ;;  %5561 = vmatprep.subr.mxu1 %v6439_v52 }
 0x220   :  { %5575 = vmatprep.subr.mxu0 %v2118_v4  ;;  %5556 = vmatmul.mubr.f32.vlgmr.msra.gmra.mxu0 %v6422_v39 }
 0x221   :  { %5562 = vmatpush3.msra.mxu1 %v6439_v52  ;;  %5576 = vmatpush3.msra.mxu0 %v2118_v4 }
 0x222   :  { %5563 = vmatprep.subr.mxu1 %v6445_v56  ;;  %5577 = vmatprep.subr.mxu0 %v2125_v18 }
 0x223   :  { %5544 = vmatprep.mubr.f32.mxu1 %v6419_v38  ;;  %5564 = vmatpush3.msra.mxu1 %v6445_v56 }
 0x224   :  { %5578 = vmatpush3.msra.mxu0 %v2125_v18  ;;  %5545 = vmatmul.mubr.f32.gmra.mxu1 %v6424_v42 }
 0x225   :  { %5565 = vmatprep.subr.mxu1 %v6426_v44  ;;  %5579 = vmatprep.subr.mxu0 %v2132_v9 }
 0x226   :  { %5558 = vmatprep.mubr.f32.mxu0 %v6429_v45  ;;  %5566 = vmatpush3.msra.mxu1 %v6426_v44 }
 0x227   :  { %5580 = vmatpush3.msra.mxu0 %v2132_v9  ;;  %5567 = vmatprep.subr.mxu1 %v6434_v49  ;;  %v6525_v9 = vpop.permute.xlu0 %112 }
 0x228   :  { %5559 = vmatmul.mubr.f32.gmra.mxu0 %v6437_v50  ;;  %5581 = vmatprep.subr.mxu0 %v2139_v24  ;;  %6914 = vst [vmem:[#allocation15_spill] sm:$0xff] %v6525_v9 }
 0x229   :  { %5568 = vmatpush3.msra.mxu1 %v6434_v49  ;;  %5569 = vmatprep.mubr.f32.mxu1 %v6386_v60 }
 0x22a   :  { %5582 = vmatpush3.msra.mxu0 %v2139_v24  ;;  %5570 = vmatmul.mubr.f32.vlgmr.msra.gmra.mxu1 %v6432_v46 }
 0x22b   :  { %5589 = vmatprep.subr.mxu1 %v6439_v52  ;;  %5583 = vmatprep.mubr.f32.mxu0 %v6379_v58  ;;  %v6529_v31 = vpop.permute.xlu0 %102 }
 0x22c   :  { %5590 = vmatpush3.msra.mxu1 %v6439_v52  ;;  %5584 = vmatmul.mubr.f32.vlgmr.msra.gmra.mxu0 %v6415_v34  ;;  %v4993_v52 = vld [vmem:[%s6877_s4 + $0x40] sm:$0xff]  ;;  %6915 = vst [vmem:[#allocation16_spill] sm:$0xff] %v6529_v31 }
 0x22d   :  { %5591 = vmatprep.subr.mxu1 %v6445_v56  ;;  %5572 = vmatprep.mubr.f32.mxu1 %v6442_v54 }
 0x22e   :  { %5592 = vmatpush3.msra.mxu1 %v6445_v56  ;;  %5586 = vmatprep.mubr.f32.mxu0 %v6419_v38 }
 0x22f   :  { %5573 = vmatmul.mubr.f32.gmra.mxu1 %v6453_v1  ;;  %5593 = vmatprep.subr.mxu1 %v6426_v44 }
 0x230   :  { %5594 = vmatpush3.msra.mxu1 %v6426_v44  ;;  %5587 = vmatmul.mubr.f32.gmra.mxu0 %v6424_v42  ;;  %v2601_v44 = vsel %vm1339_vm3, %v4993_v52, 0 }
 0x231   :  { %5595 = vmatprep.subr.mxu1 %v6434_v49  ;;  %5597 = vmatprep.mubr.f32.mxu1 %v6379_v58  ;;  %v6515_v53 = vand.u32 4294901760, %v2601_v44 }
 0x232   :  { %5596 = vmatpush3.msra.mxu1 %v6434_v49 }
 0x233   :  { %5598 = vmatmul.mubr.f32.vlgmr.msra.gmra.mxu1 %v6415_v34  ;;  %v6518_v55 = vsub.f32 %v2601_v44, %v6515_v53 }
 0x234   :  { %5600 = vmatprep.mubr.f32.mxu1 %v6419_v38 }
 0x235   :  { %v6882_v49 = vand.u32 4294901760, %v6518_v55 }
 0x237   :  { %5601 = vmatmul.mubr.f32.gmra.mxu1 %v6424_v42  ;;  %v2684_v56 = vsub.f32 %v6518_v55, %v6882_v49 }
 0x238   :  { %5625 = vmatprep.mubr.f32.mxu1 %v6515_v53 }
 0x239   :  { %v2685_v61 = vand.u32 4294901760, %v2684_v56 }
 0x23b   :  { %5611 = vmatprep.mubr.f32.mxu0 %v2685_v61 }
 0x2d5   :  { %v5529_v0 = vpop.f32.mrf.mxu0 }
 0x2d6   :  { %v2068_v33 = vadd.f32 %v5529_v0, %v6529_v31 }
 0x2d7   :  { %v2057_v3 = vpop.f32.mrf.mxu0 }
 0x2d8   :  { %v2058_v43 = vadd.f32 %v2057_v3, %v6532_v40 }
 0x2da   :  { %v5532_v4 = vpop.f32.mrf.mxu0 }
 0x2db   :  { %v2088_v44 = vadd.f32 %v5532_v4, %v6525_v9 }
 0x2dc   :  { %v2077_v5 = vpop.f32.mrf.mxu0 }
 0x2dd   :  { %v2078_v1 = vadd.f32 %v2077_v5, %v6527_v21 }
 0x2de   :  { %v5543_v8 = vpop.f32.mrf.mxu1 }
 0x2df   :  { %v2185_v47 = vadd.f32 %v5543_v8, %v2068_v33 }
 0x2e0   :  { %v2178_v15 = vpop.f32.mrf.mxu1  ;;  %v5557_v18 = vpop.f32.mrf.mxu0 }
 0x2e1   :  { %v2179_v56 = vadd.f32 %v2178_v15, %v2058_v43  ;;  %v2284_v54 = vadd.f32 %v5557_v18, %v2185_v47 }
 0x2e2   :  { %v2276_v28 = vpop.f32.mrf.mxu0 }
 0x2e3   :  { %v2277_v45 = vadd.f32 %v2276_v28, %v2179_v56 }
 0x2e4   :  { %v5546_v24 = vpop.f32.mrf.mxu1 }
 0x2e5   :  { %v2197_v46 = vadd.f32 %v5546_v24, %v2088_v44 }
 0x2e6   :  { %v2190_v36 = vpop.f32.mrf.mxu1 }
 0x2e7   :  { %v2191_v0 = vadd.f32 %v2190_v36, %v2078_v1 }
 0x2e8   :  { %v5560_v52 = vpop.f32.mrf.mxu0 }
 0x2e9   :  { %v2298_v39 = vadd.f32 %v5560_v52, %v2197_v46 }
 0x2ea   :  { %v2290_v61 = vpop.f32.mrf.mxu0  ;;  %v5571_v49 = vpop.f32.mrf.mxu1 }
 0x2eb   :  { %v2383_v31 = vadd.f32 %v5571_v49, %v2284_v54  ;;  %v2291_v40 = vadd.f32 %v2290_v61, %v2191_v0 }
 0x2ec   :  { %v2374_v60 = vpop.f32.mrf.mxu1  ;;  %v5585_v50 = vpop.f32.mrf.mxu0 }
 0x2ed   :  { %v2375_v3 = vadd.f32 %v2374_v60, %v2277_v45  ;;  %v2488_v4 = vadd.f32 %v5585_v50, %v2383_v31  ;;  %v4994_v60 = vld [vmem:[%s6877_s4 + $0x48] sm:$0xff] }
 0x2ee   :  { %v2481_v42 = vpop.f32.mrf.mxu0 }
 0x2ef   :  { %v5574_v38 = vpop.f32.mrf.mxu1  ;;  %v2482_v9 = vadd.f32 %v2481_v42, %v2375_v3  ;;  %v4995_v42 = vld [vmem:[%s6877_s4 + $0x50] sm:$0xff] }
 0x2f0   :  { %v5588_v33 = vpop.f32.mrf.mxu0  ;;  %v2399_v15 = vadd.f32 %v5574_v38, %v2298_v39  ;;  %v2604_v39 = vsel %vm1339_vm3, %v4994_v60, 0  ;;  %v2607_v50 = vsel %vm1339_vm3, %v4995_v42, 0 }
 0x2f1   :  { %v2390_v8 = vpop.f32.mrf.mxu1  ;;  %v6547_v46 = vand.u32 4294901760, %v2604_v39  ;;  %v6551_v31 = vand.u32 4294901760, %v2607_v50 }
 0x2f2   :  { %v2391_v59 = vadd.f32 %v2390_v8, %v2291_v40  ;;  %v2493_v18 = vpop.f32.mrf.mxu0  ;;  %v2500_v47 = vadd.f32 %v5588_v33, %v2399_v15 }
 0x2f3   :  { %v5599_v43 = vpop.f32.mrf.mxu1  ;;  %v6554_v36 = vsub.f32 %v2604_v39, %v6547_v46  ;;  %v6566_v61 = vsub.f32 %v2607_v50, %v6551_v31 }
 0x2f4   :  { %v2581_v5 = vadd.f32 %v5599_v43, %v2488_v4  ;;  %v2494_v54 = vadd.f32 %v2493_v18, %v2391_v59  ;;  %v4996_v59 = vld [vmem:[%s6877_s4 + $0x58] sm:$0xff] }
 0x2f5   :  { %v2574_v24 = vpop.f32.mrf.mxu1  ;;  %v6898_v0 = vand.u32 4294901760, %v6554_v36  ;;  %v6899_v43 = vand.u32 4294901760, %v6566_v61 }
 0x2f6   :  { %5943 = vtanh.f32 %v2581_v5  ;;  %v2575_v28 = vadd.f32 %v2574_v24, %v2482_v9  ;;  %v2610_v9 = vsel %vm1339_vm3, %v4996_v59, 0 }
 0x2f7   :  { %v5602_v1 = vpop.f32.mrf.mxu1  ;;  %v6558_v52 = vand.u32 4294901760, %v2610_v9  ;;  %v2694_v24 = vsub.f32 %v6554_v36, %v6898_v0  ;;  %v2704_v60 = vsub.f32 %v6566_v61, %v6899_v43 }
 0x2f8   :  { %5945 = vtanh.f32 %v2575_v28  ;;  %v2593_v49 = vadd.f32 %v5602_v1, %v2500_v47 }
 0x2f9   :  { %v2586_v45 = vpop.f32.mrf.mxu1  ;;  %v6575_v33 = vsub.f32 %v2610_v9, %v6558_v52  ;;  %v2705_v43 = vand.u32 4294901760, %v2704_v60 }
 0x2fa   :  { %5947 = vtanh.f32 %v2593_v49  ;;  %v2587_v38 = vadd.f32 %v2586_v45, %v2494_v54 }
 0x2fb   :  { %v6903_v28 = vand.u32 4294901760, %v6575_v33 }
 0x2fc   :  { %5949 = vtanh.f32 %v2587_v38  ;;  %v2695_v38 = vand.u32 4294901760, %v2694_v24 }
 0x2fd   :  { %v2714_v59 = vsub.f32 %v6575_v33, %v6903_v28 }
 0x303   :  { %v6556_v40 = vpop.eup %5943 }
 0x304   :  { %v6563_v56 = vand.u32 4294901760, %v6556_v40 }
 0x305   :  { %v6560_v44 = vpop.eup %5945 }
 0x306   :  { %6917 = vst [vmem:[#allocation18_spill] sm:$0xff] %v6560_v44  ;;  %v6572_v8 = vand.u32 4294901760, %v6560_v44  ;;  %v2761_v5 = vsub.f32 %v6556_v40, %v6563_v56 }
 0x307   :  { %v6569_v3 = vpop.eup %5947 }
 0x308   :  { %6918 = vst [vmem:[#allocation19_spill] sm:$0xff] %v6569_v3  ;;  %v6578_v4 = vand.u32 4294901760, %v6569_v3  ;;  %v2768_v1 = vsub.f32 %v6560_v44, %v6572_v8  ;;  %v2762_v45 = vand.u32 4294901760, %v2761_v5 }
 0x309   :  { %v6580_v15 = vpop.eup %5949 }
 0x30a   :  { %6919 = vst [vmem:[#allocation20_spill] sm:$0xff] %v6580_v15  ;;  %5603 = vmatprep.subr.mxu0 %v6578_v4  ;;  %v6587_v18 = vand.u32 4294901760, %v6580_v15  ;;  %v2747_v47 = vsub.f32 %v6569_v3, %v6578_v4  ;;  %v2769_v50 = vand.u32 4294901760, %v2768_v1  ;;  %v2715_v3 = vand.u32 4294901760, %v2714_v59 }
 0x30b   :  { %5604 = vmatpush3.msra.mxu0 %v6578_v4 }
 0x30c   :  { %5605 = vmatprep.subr.mxu0 %v6587_v18  ;;  %v2748_v54 = vand.u32 4294901760, %v2747_v47  ;;  %v2754_v49 = vsub.f32 %v6580_v15, %v6587_v18  ;;  %v2763_v15 = vsub.f32 %v2761_v5, %v2762_v45  ;;  %v2770_v44 = vsub.f32 %v2768_v1, %v2769_v50 }
 0x30d   :  { %5606 = vmatpush3.msra.mxu0 %v6587_v18 }
 0x30e   :  { %5607 = vmatprep.subr.mxu0 %v6563_v56  ;;  %v2749_v39 = vsub.f32 %v2747_v47, %v2748_v54  ;;  %v2755_v42 = vand.u32 4294901760, %v2754_v49  ;;  %v2764_v28 = vand.u32 4294901760, %v2763_v15  ;;  %v133_v15 = vpop.permute.xlu0 %132 }
 0x30f   :  { %5608 = vmatpush3.msra.mxu0 %v6563_v56 }
 0x310   :  { %5609 = vmatprep.subr.mxu0 %v6572_v8  ;;  %v2750_v9 = vand.u32 4294901760, %v2749_v39  ;;  %v2756_v0 = vsub.f32 %v2754_v49, %v2755_v42  ;;  %v2771_v39 = vand.u32 4294901760, %v2770_v44  ;;  %v6920_v44 = vand.u32 4294901760, %v6518_v55 }
 0x311   :  { %5610 = vmatpush3.msra.mxu0 %v6572_v8 }
 0x312   :  { %5612 = vmatmul.mubr.f32.vlgmr.msra.gmra.mxu0 %v2695_v38  ;;  %5617 = vmatprep.subr.mxu1 %v2750_v9  ;;  %v2757_v24 = vand.u32 4294901760, %v2756_v0  ;;  %v6921_v0 = vand.u32 4294901760, %v6554_v36 }
 0x313   :  { %5631 = vmatprep.subr.mxu0 %v2747_v47  ;;  %5618 = vmatpush3.msra.mxu1 %v2750_v9 }
 0x314   :  { %5632 = vmatpush3.msra.mxu0 %v2747_v47  ;;  %5619 = vmatprep.subr.mxu1 %v2757_v24 }
 0x315   :  { %5633 = vmatprep.subr.mxu0 %v2754_v49  ;;  %5614 = vmatprep.mubr.f32.mxu0 %v2705_v43 }
 0x316   :  { %5620 = vmatpush3.msra.mxu1 %v2757_v24  ;;  %5634 = vmatpush3.msra.mxu0 %v2754_v49 }
 0x317   :  { %5615 = vmatmul.mubr.f32.gmra.mxu0 %v2715_v3  ;;  %5621 = vmatprep.subr.mxu1 %v2764_v28  ;;  %v6922_v3 = vand.u32 4294901760, %v6566_v61 }
 0x318   :  { %5635 = vmatprep.subr.mxu0 %v2761_v5  ;;  %5622 = vmatpush3.msra.mxu1 %v2764_v28 }
 0x319   :  { %5636 = vmatpush3.msra.mxu0 %v2761_v5  ;;  %5623 = vmatprep.subr.mxu1 %v2771_v39  ;;  %v128_v5 = vpop.permute.xlu1 %127 }
 0x31a   :  { %5637 = vmatprep.subr.mxu0 %v2768_v1  ;;  %5624 = vmatpush3.msra.mxu1 %v2771_v39 }
 0x31b   :  { %5638 = vmatpush3.msra.mxu0 %v2768_v1  ;;  %5626 = vmatmul.mubr.f32.vlgmr.msra.gmra.mxu1 %v6547_v46 }
 0x31c   :  { %5639 = vmatprep.mubr.f32.mxu0 %v6518_v55  ;;  %5645 = vmatprep.subr.mxu1 %v6578_v4  ;;  %v6923_v55 = vand.u32 4294901760, %v6575_v33 }
 0x31d   :  { %5659 = vmatprep.subr.mxu0 %v2748_v54  ;;  %5640 = vmatmul.mubr.f32.vlgmr.msra.gmra.mxu0 %v6554_v36  ;;  %v118_v28 = vpop.permute.xlu1 %117 }
 0x31e   :  { %5646 = vmatpush3.msra.mxu1 %v6578_v4  ;;  %5660 = vmatpush3.msra.mxu0 %v2748_v54 }
 0x31f   :  { %5647 = vmatprep.subr.mxu1 %v6587_v18  ;;  %5661 = vmatprep.subr.mxu0 %v2755_v42 }
 0x320   :  { %5628 = vmatprep.mubr.f32.mxu1 %v6551_v31  ;;  %5648 = vmatpush3.msra.mxu1 %v6587_v18 }
 0x321   :  { %5662 = vmatpush3.msra.mxu0 %v2755_v42  ;;  %5629 = vmatmul.mubr.f32.gmra.mxu1 %v6558_v52 }
 0x322   :  { %5649 = vmatprep.subr.mxu1 %v6563_v56  ;;  %5663 = vmatprep.subr.mxu0 %v2762_v45 }
 0x323   :  { %5642 = vmatprep.mubr.f32.mxu0 %v6566_v61  ;;  %5650 = vmatpush3.msra.mxu1 %v6563_v56 }
 0x324   :  { %5664 = vmatpush3.msra.mxu0 %v2762_v45  ;;  %5651 = vmatprep.subr.mxu1 %v6572_v8 }
 0x325   :  { %5643 = vmatmul.mubr.f32.gmra.mxu0 %v6575_v33  ;;  %5665 = vmatprep.subr.mxu0 %v2769_v50 }
 0x326   :  { %5652 = vmatpush3.msra.mxu1 %v6572_v8  ;;  %5653 = vmatprep.mubr.f32.mxu1 %v6920_v44 }
 0x327   :  { %5666 = vmatpush3.msra.mxu0 %v2769_v50  ;;  %5654 = vmatmul.mubr.f32.vlgmr.msra.gmra.mxu1 %v6921_v0 }
 0x328   :  { %5673 = vmatprep.subr.mxu1 %v6578_v4  ;;  %5667 = vmatprep.mubr.f32.mxu0 %v6515_v53 }
 0x329   :  { %5674 = vmatpush3.msra.mxu1 %v6578_v4  ;;  %5668 = vmatmul.mubr.f32.vlgmr.msra.gmra.mxu0 %v6547_v46 }
 0x32a   :  { %5675 = vmatprep.subr.mxu1 %v6587_v18  ;;  %5656 = vmatprep.mubr.f32.mxu1 %v6922_v3 }
 0x32b   :  { %5676 = vmatpush3.msra.mxu1 %v6587_v18  ;;  %5670 = vmatprep.mubr.f32.mxu0 %v6551_v31 }
 0x32c   :  { %5657 = vmatmul.mubr.f32.gmra.mxu1 %v6923_v55  ;;  %5677 = vmatprep.subr.mxu1 %v6563_v56 }
 0x32d   :  { %5678 = vmatpush3.msra.mxu1 %v6563_v56  ;;  %5671 = vmatmul.mubr.f32.gmra.mxu0 %v6558_v52 }
 0x32e   :  { %5679 = vmatprep.subr.mxu1 %v6572_v8  ;;  %5681 = vmatprep.mubr.f32.mxu1 %v6515_v53 }
 0x32f   :  { %5680 = vmatpush3.msra.mxu1 %v6572_v8  ;;  %5695 = vmatprep.mubr.f32.mxu0 %v6254_v29  ;;  %v123_v29 = vpop.permute.xlu0 %122 }
 0x330   :  { %5682 = vmatmul.mubr.f32.vlgmr.msra.gmra.mxu1 %v6547_v46 }
 0x331   :  { %5684 = vmatprep.mubr.f32.mxu1 %v6551_v31 }
 0x334   :  { %5685 = vmatmul.mubr.f32.gmra.mxu1 %v6558_v52 }
 0x335   :  { %5709 = vmatprep.mubr.f32.mxu1 %v6243_v25 }
 0x3d2   :  { %v5613_v36 = vpop.f32.mrf.mxu0 }
 0x3d3   :  { %v2698_v47 = vadd.f32 %v5613_v36, %v123_v29 }
 0x3d4   :  { %v2687_v56 = vpop.f32.mrf.mxu0 }
 0x3d5   :  { %v2688_v31 = vadd.f32 %v2687_v56, %v118_v28 }
 0x3d7   :  { %v5616_v61 = vpop.f32.mrf.mxu0 }
 0x3d8   :  { %v2718_v54 = vadd.f32 %v5616_v61, %v133_v15 }
 0x3d9   :  { %v2707_v33 = vpop.f32.mrf.mxu0 }
 0x3da   :  { %v2708_v38 = vadd.f32 %v2707_v33, %v128_v5 }
 0x3db   :  { %v5627_v4 = vpop.f32.mrf.mxu1 }
 0x3dc   :  { %v2815_v1 = vadd.f32 %v5627_v4, %v2698_v47 }
 0x3dd   :  { %v2808_v43 = vpop.f32.mrf.mxu1  ;;  %v5641_v53 = vpop.f32.mrf.mxu0 }
 0x3de   :  { %v2809_v49 = vadd.f32 %v2808_v43, %v2688_v31  ;;  %v2914_v42 = vadd.f32 %v5641_v53, %v2815_v1 }
 0x3df   :  { %v2906_v18 = vpop.f32.mrf.mxu0 }
 0x3e0   :  { %v2907_v24 = vadd.f32 %v2906_v18, %v2809_v49 }
 0x3e1   :  { %v5630_v8 = vpop.f32.mrf.mxu1 }
 0x3e2   :  { %v2827_v59 = vadd.f32 %v5630_v8, %v2718_v54 }
 0x3e3   :  { %v2820_v46 = vpop.f32.mrf.mxu1 }
 0x3e4   :  { %v2821_v39 = vadd.f32 %v2820_v46, %v2708_v38 }
 0x3e5   :  { %v5644_v52 = vpop.f32.mrf.mxu0 }
 0x3e6   :  { %v2928_v55 = vadd.f32 %v5644_v52, %v2827_v59 }
 0x3e7   :  { %v2920_v60 = vpop.f32.mrf.mxu0  ;;  %v5655_v45 = vpop.f32.mrf.mxu1 }
 0x3e8   :  { %v3013_v44 = vadd.f32 %v5655_v45, %v2914_v42  ;;  %v2921_v4 = vadd.f32 %v2920_v60, %v2821_v39 }
 0x3e9   :  { %v3004_v50 = vpop.f32.mrf.mxu1  ;;  %v5669_v9 = vpop.f32.mrf.mxu0 }
 0x3ea   :  { %v3005_v36 = vadd.f32 %v3004_v50, %v2907_v24  ;;  %v3118_v47 = vadd.f32 %v5669_v9, %v3013_v44 }
 0x3eb   :  { %v3111_v0 = vpop.f32.mrf.mxu0 }
 0x3ec   :  { %v5658_v3 = vpop.f32.mrf.mxu1  ;;  %v3112_v43 = vadd.f32 %v3111_v0, %v3005_v36 }
 0x3ed   :  { %v5672_v56 = vpop.f32.mrf.mxu0  ;;  %v3029_v61 = vadd.f32 %v5658_v3, %v2928_v55 }
 0x3ee   :  { %v3020_v29 = vpop.f32.mrf.mxu1 }
 0x3ef   :  { %v3021_v28 = vadd.f32 %v3020_v29, %v2921_v4  ;;  %v3123_v53 = vpop.f32.mrf.mxu0  ;;  %v3130_v8 = vadd.f32 %v5672_v56, %v3029_v61 }
 0x3f0   :  { %v5683_v15 = vpop.f32.mrf.mxu1 }
 0x3f1   :  { %v3211_v33 = vadd.f32 %v5683_v15, %v3118_v47  ;;  %v3124_v1 = vadd.f32 %v3123_v53, %v3021_v28 }
 0x3f2   :  { %v3204_v5 = vpop.f32.mrf.mxu1 }
 0x3f3   :  { %v3227_v31 = vmul.f32 0.5, %v3211_v33  ;;  %v3205_v18 = vadd.f32 %v3204_v5, %v3112_v43 }
 0x3f4   :  { %v5686_v46 = vpop.f32.mrf.mxu1 }
 0x3f5   :  { %v3231_v54 = vadd.f32 %v3227_v31, %v6257_v57  ;;  %v3226_v52 = vmul.f32 0.5, %v3205_v18  ;;  %v3223_v49 = vadd.f32 %v5686_v46, %v3130_v8 }
 0x3f6   :  { %v3216_v45 = vpop.f32.mrf.mxu1 }
 0x3f7   :  { %5951 = vtanh.f32 %v3231_v54  ;;  %v3230_v60 = vadd.f32 %v3226_v52, %v6260_v62  ;;  %v3229_v38 = vmul.f32 0.5, %v3223_v49  ;;  %v3217_v42 = vadd.f32 %v3216_v45, %v3124_v1 }
 0x3f9   :  { %5953 = vtanh.f32 %v3230_v60  ;;  %v3233_v59 = vadd.f32 %v3229_v38, %v6263_v2  ;;  %v3228_v50 = vmul.f32 0.5, %v3217_v42 }
 0x3fb   :  { %5955 = vtanh.f32 %v3233_v59  ;;  %v3232_v9 = vadd.f32 %v3228_v50, %v6269_v6 }
 0x3fd   :  { %5957 = vtanh.f32 %v3232_v9 }
 0x404   :  { %v5952_v24 = vpop.eup %5951 }
 0x405   :  { %v6657_v44 = vand.u32 4294901760, %v5952_v24 }
 0x406   :  { %v5954_v39 = vpop.eup %5953 }
 0x407   :  { %v6659_v0 = vand.u32 4294901760, %v5954_v39  ;;  %v3387_v55 = vsub.f32 %v5952_v24, %v6657_v44 }
 0x408   :  { %v5956_v57 = vpop.eup %5955 }
 0x409   :  { %v6661_v3 = vand.u32 4294901760, %v5956_v57  ;;  %v3394_v6 = vsub.f32 %v5954_v39, %v6659_v0  ;;  %v3388_v4 = vand.u32 4294901760, %v3387_v55 }
 0x40a   :  { %v5958_v62 = vpop.eup %5957 }
 0x40b   :  { %v6664_v36 = vand.u32 4294901760, %v5958_v62  ;;  %5687 = vmatprep.subr.mxu0 %v6661_v3  ;;  %v3373_v2 = vsub.f32 %v5956_v57, %v6661_v3  ;;  %v3395_v15 = vand.u32 4294901760, %v3394_v6  ;;  %v3389_v33 = vsub.f32 %v3387_v55, %v3388_v4 }
 0x40c   :  { %5688 = vmatpush3.msra.mxu0 %v6661_v3 }
 0x40d   :  { %5689 = vmatprep.subr.mxu0 %v6664_v36  ;;  %v3374_v29 = vand.u32 4294901760, %v3373_v2  ;;  %v3380_v56 = vsub.f32 %v5958_v62, %v6664_v36  ;;  %v3396_v5 = vsub.f32 %v3394_v6, %v3395_v15  ;;  %v3390_v8 = vand.u32 4294901760, %v3389_v33 }
 0x40e   :  { %5690 = vmatpush3.msra.mxu0 %v6664_v36 }
 0x40f   :  { %5691 = vmatprep.subr.mxu0 %v6657_v44  ;;  %v3375_v47 = vsub.f32 %v3373_v2, %v3374_v29  ;;  %v3381_v61 = vand.u32 4294901760, %v3380_v56  ;;  %v3397_v31 = vand.u32 4294901760, %v3396_v5 }
 0x410   :  { %5692 = vmatpush3.msra.mxu0 %v6657_v44 }
 0x411   :  { %5693 = vmatprep.subr.mxu0 %v6659_v0  ;;  %v3376_v43 = vand.u32 4294901760, %v3375_v47  ;;  %v3382_v28 = vsub.f32 %v3380_v56, %v3381_v61 }
 0x412   :  { %5694 = vmatpush3.msra.mxu0 %v6659_v0 }
 0x413   :  { %5696 = vmatmul.mubr.f32.vlgmr.msra.gmra.mxu0 %v6326_v41  ;;  %5701 = vmatprep.subr.mxu1 %v3376_v43  ;;  %v3383_v53 = vand.u32 4294901760, %v3382_v28 }
 0x414   :  { %5715 = vmatprep.subr.mxu0 %v3373_v2  ;;  %5702 = vmatpush3.msra.mxu1 %v3376_v43 }
 0x415   :  { %5716 = vmatpush3.msra.mxu0 %v3373_v2  ;;  %5703 = vmatprep.subr.mxu1 %v3383_v53 }
 0x416   :  { %5717 = vmatprep.subr.mxu0 %v3380_v56  ;;  %5698 = vmatprep.mubr.f32.mxu0 %v6333_v48 }
 0x417   :  { %5704 = vmatpush3.msra.mxu1 %v3383_v53  ;;  %5718 = vmatpush3.msra.mxu0 %v3380_v56 }
 0x418   :  { %5699 = vmatmul.mubr.f32.gmra.mxu0 %v6336_v51  ;;  %5705 = vmatprep.subr.mxu1 %v3390_v8 }
 0x419   :  { %5719 = vmatprep.subr.mxu0 %v3387_v55  ;;  %5706 = vmatpush3.msra.mxu1 %v3390_v8 }
 0x41a   :  { %5720 = vmatpush3.msra.mxu0 %v3387_v55  ;;  %5707 = vmatprep.subr.mxu1 %v3397_v31 }
 0x41b   :  { %5721 = vmatprep.subr.mxu0 %v3394_v6  ;;  %5708 = vmatpush3.msra.mxu1 %v3397_v31 }
 0x41c   :  { %5722 = vmatpush3.msra.mxu0 %v3394_v6  ;;  %5710 = vmatmul.mubr.f32.vlgmr.msra.gmra.mxu1 %v6279_v10 }
 0x41d   :  { %5723 = vmatprep.mubr.f32.mxu0 %v6246_v26  ;;  %5729 = vmatprep.subr.mxu1 %v6661_v3 }
 0x41e   :  { %5743 = vmatprep.subr.mxu0 %v3374_v29  ;;  %5724 = vmatmul.mubr.f32.vlgmr.msra.gmra.mxu0 %v6286_v14 }
 0x41f   :  { %5730 = vmatpush3.msra.mxu1 %v6661_v3  ;;  %5744 = vmatpush3.msra.mxu0 %v3374_v29 }
 0x420   :  { %5731 = vmatprep.subr.mxu1 %v6664_v36  ;;  %5745 = vmatprep.subr.mxu0 %v3381_v61 }
 0x421   :  { %5712 = vmatprep.mubr.f32.mxu1 %v6283_v13  ;;  %5732 = vmatpush3.msra.mxu1 %v6664_v36 }
 0x422   :  { %5746 = vmatpush3.msra.mxu0 %v3381_v61  ;;  %5713 = vmatmul.mubr.f32.gmra.mxu1 %v6288_v16 }
 0x423   :  { %5733 = vmatprep.subr.mxu1 %v6657_v44  ;;  %5747 = vmatprep.subr.mxu0 %v3388_v4 }
 0x424   :  { %5726 = vmatprep.mubr.f32.mxu0 %v6293_v19  ;;  %5734 = vmatpush3.msra.mxu1 %v6657_v44 }
 0x425   :  { %5748 = vmatpush3.msra.mxu0 %v3388_v4  ;;  %5735 = vmatprep.subr.mxu1 %v6659_v0 }
 0x426   :  { %5727 = vmatmul.mubr.f32.gmra.mxu0 %v6301_v23  ;;  %5749 = vmatprep.subr.mxu0 %v3395_v15 }
 0x427   :  { %5736 = vmatpush3.msra.mxu1 %v6659_v0  ;;  %5737 = vmatprep.mubr.f32.mxu1 %v6250_v27 }
 0x428   :  { %5750 = vmatpush3.msra.mxu0 %v3395_v15  ;;  %5738 = vmatmul.mubr.f32.vlgmr.msra.gmra.mxu1 %v6296_v20 }
 0x429   :  { %5757 = vmatprep.subr.mxu1 %v6661_v3  ;;  %5751 = vmatprep.mubr.f32.mxu0 %v6243_v25 }
 0x42a   :  { %5758 = vmatpush3.msra.mxu1 %v6661_v3  ;;  %5752 = vmatmul.mubr.f32.vlgmr.msra.gmra.mxu0 %v6279_v10 }
 0x42b   :  { %5759 = vmatprep.subr.mxu1 %v6664_v36  ;;  %5740 = vmatprep.mubr.f32.mxu1 %v6306_v30 }
 0x42c   :  { %5760 = vmatpush3.msra.mxu1 %v6664_v36  ;;  %5754 = vmatprep.mubr.f32.mxu0 %v6283_v13 }
 0x42d   :  { %5741 = vmatmul.mubr.f32.gmra.mxu1 %v6317_v35  ;;  %5761 = vmatprep.subr.mxu1 %v6657_v44 }
 0x42e   :  { %5762 = vmatpush3.msra.mxu1 %v6657_v44  ;;  %5755 = vmatmul.mubr.f32.gmra.mxu0 %v6288_v16 }
 0x42f   :  { %5763 = vmatprep.subr.mxu1 %v6659_v0  ;;  %5765 = vmatprep.mubr.f32.mxu1 %v6243_v25 }
 0x430   :  { %5764 = vmatpush3.msra.mxu1 %v6659_v0  ;;  %5779 = vmatprep.mubr.f32.mxu0 %v6390_v63 }
 0x431   :  { %5766 = vmatmul.mubr.f32.vlgmr.msra.gmra.mxu1 %v6279_v10 }
 0x432   :  { %5768 = vmatprep.mubr.f32.mxu1 %v6283_v13 }
 0x435   :  { %5769 = vmatmul.mubr.f32.gmra.mxu1 %v6288_v16 }
 0x436   :  { %5793 = vmatprep.mubr.f32.mxu1 %v6379_v58 }
 0x4d3   :  { %v5697_v26 = vpop.f32.mrf.mxu0 }
 0x4d4   :  { %v3324_v41 = vadd.f32 %v5697_v26, %v6397_v17 }
 0x4d5   :  { %v3313_v27 = vpop.f32.mrf.mxu0 }
 0x4d6   :  { %v3314_v10 = vadd.f32 %v3313_v27, %v6400_v22 }
 0x4d8   :  { %v5700_v14 = vpop.f32.mrf.mxu0 }
 0x4d9   :  { %v3344_v16 = vadd.f32 %v5700_v14, %v6393_v7 }
 0x4da   :  { %v3333_v19 = vpop.f32.mrf.mxu0 }
 0x4db   :  { %v3334_v1 = vadd.f32 %v3333_v19, %v6395_v11 }
 0x4dc   :  { %v5711_v20 = vpop.f32.mrf.mxu1 }
 0x4dd   :  { %v3441_v51 = vadd.f32 %v5711_v20, %v3324_v41 }
 0x4de   :  { %v3434_v23 = vpop.f32.mrf.mxu1  ;;  %v5725_v30 = vpop.f32.mrf.mxu0 }
 0x4df   :  { %v3435_v63 = vadd.f32 %v3434_v23, %v3314_v10  ;;  %v3540_v54 = vadd.f32 %v5725_v30, %v3441_v51 }
 0x4e0   :  { %v3532_v35 = vpop.f32.mrf.mxu0 }
 0x4e1   :  { %v3533_v60 = vadd.f32 %v3532_v35, %v3435_v63  ;;  %v6927_v63 = vld [vmem:[#allocation9_spill] sm:$0xff] }
 0x4e2   :  { %v5714_v25 = vpop.f32.mrf.mxu1 }
 0x4e3   :  { %v3453_v52 = vadd.f32 %v5714_v25, %v3344_v16 }
 0x4e4   :  { %v3446_v48 = vpop.f32.mrf.mxu1 }
 0x4e5   :  { %v3447_v38 = vadd.f32 %v3446_v48, %v3334_v1  ;;  %v6930_v1 = vld [vmem:[#allocation6_spill] sm:$0xff] }
 0x4e6   :  { %v5728_v13 = vpop.f32.mrf.mxu0 }
 0x4e7   :  { %v3554_v50 = vadd.f32 %v5728_v13, %v3453_v52  ;;  %v6932_v52 = vld [vmem:[#allocation13_spill] sm:$0xff] }
 0x4e8   :  { %v3546_v18 = vpop.f32.mrf.mxu0  ;;  %v5739_v46 = vpop.f32.mrf.mxu1 }
 0x4e9   :  { %v3639_v42 = vadd.f32 %v5739_v46, %v3540_v54  ;;  %v3547_v39 = vadd.f32 %v3546_v18, %v3447_v38  ;;  %v6928_v18 = vld [vmem:[#allocation10_spill] sm:$0xff]  ;;  %v6929_v46 = vld [vmem:[#allocation12_spill] sm:$0xff]  ;;  %v6931_v54 = vld [vmem:[#allocation11_spill] sm:$0xff] }
 0x4ea   :  { %v3630_v49 = vpop.f32.mrf.mxu1  ;;  %v5753_v45 = vpop.f32.mrf.mxu0 }
 0x4eb   :  { %v3631_v22 = vadd.f32 %v3630_v49, %v3533_v60  ;;  %v3744_v7 = vadd.f32 %v5753_v45, %v3639_v42  ;;  %v6933_v49 = vld [vmem:[#allocation14_spill] sm:$0xff]  ;;  %v5999_v45 = vmov 0.0  }
 0x4ec   :  { %v3737_v17 = vpop.f32.mrf.mxu0 }
 0x4ed   :  { %v5742_v59 = vpop.f32.mrf.mxu1  ;;  %v3738_v0 = vadd.f32 %v3737_v17, %v3631_v22 }
 0x4ee   :  { %v5756_v24 = vpop.f32.mrf.mxu0  ;;  %v3655_v44 = vadd.f32 %v5742_v59, %v3554_v50 }
 0x4ef   :  { %v3646_v9 = vpop.f32.mrf.mxu1 }
 0x4f0   :  { %v3647_v3 = vadd.f32 %v3646_v9, %v3547_v39  ;;  %v3749_v62 = vpop.f32.mrf.mxu0  ;;  %v3756_v36 = vadd.f32 %v5756_v24, %v3655_v44  ;;  %v6934_v9 = vld [vmem:[#allocation16_spill] sm:$0xff] }
 0x4f1   :  { %v5767_v57 = vpop.f32.mrf.mxu1 }
 0x4f2   :  { %v3837_v11 = vadd.f32 %v5767_v57, %v3744_v7  ;;  %v3750_v29 = vadd.f32 %v3749_v62, %v3647_v3  ;;  %v6935_v7 = vld [vmem:[#allocation17_spill] sm:$0xff]  ;;  %v6936_v3 = vld [vmem:[#allocation15_spill] sm:$0xff] }
 0x4f3   :  { %v3830_v55 = vpop.f32.mrf.mxu1 }
 0x4f4   :  { %5959 = vtanh.f32 %v3837_v11  ;;  %v3831_v2 = vadd.f32 %v3830_v55, %v3738_v0 }
 0x4f5   :  { %v5770_v6 = vpop.f32.mrf.mxu1 }
 0x4f6   :  { %5961 = vtanh.f32 %v3831_v2  ;;  %v3849_v56 = vadd.f32 %v5770_v6, %v3756_v36 }
 0x4f7   :  { %v3842_v4 = vpop.f32.mrf.mxu1 }
 0x4f8   :  { %5963 = vtanh.f32 %v3849_v56  ;;  %v3843_v47 = vadd.f32 %v3842_v4, %v3750_v29 }
 0x4fa   :  { %5965 = vtanh.f32 %v3843_v47 }
 0x501   :  { %v5960_v61 = vpop.eup %5959 }
 0x502   :  { %v6721_v43 = vand.u32 4294901760, %v5960_v61 }
 0x503   :  { %v5962_v15 = vpop.eup %5961 }
 0x504   :  { %v6723_v33 = vand.u32 4294901760, %v5962_v15  ;;  %v4005_v8 = vsub.f32 %v5960_v61, %v6721_v43 }
 0x505   :  { %v5964_v28 = vpop.eup %5963 }
 0x506   :  { %v6725_v53 = vand.u32 4294901760, %v5964_v28  ;;  %v4012_v27 = vsub.f32 %v5962_v15, %v6723_v33  ;;  %v4006_v20 = vand.u32 4294901760, %v4005_v8 }
 0x507   :  { %v5966_v5 = vpop.eup %5965 }
 0x508   :  { %v6728_v31 = vand.u32 4294901760, %v5966_v5  ;;  %5771 = vmatprep.subr.mxu0 %v6725_v53  ;;  %v3991_v26 = vsub.f32 %v5964_v28, %v6725_v53  ;;  %v4013_v25 = vand.u32 4294901760, %v4012_v27  ;;  %v4007_v48 = vsub.f32 %v4005_v8, %v4006_v20 }
 0x509   :  { %5772 = vmatpush3.msra.mxu0 %v6725_v53 }
 0x50a   :  { %5773 = vmatprep.subr.mxu0 %v6728_v31  ;;  %v3992_v14 = vand.u32 4294901760, %v3991_v26  ;;  %v3998_v19 = vsub.f32 %v5966_v5, %v6728_v31  ;;  %v4014_v51 = vsub.f32 %v4012_v27, %v4013_v25  ;;  %v4008_v13 = vand.u32 4294901760, %v4007_v48 }
 0x50b   :  { %5774 = vmatpush3.msra.mxu0 %v6728_v31 }
 0x50c   :  { %5775 = vmatprep.subr.mxu0 %v6721_v43  ;;  %v3993_v23 = vsub.f32 %v3991_v26, %v3992_v14  ;;  %v3999_v30 = vand.u32 4294901760, %v3998_v19  ;;  %v4015_v16 = vand.u32 4294901760, %v4014_v51 }
 0x50d   :  { %5776 = vmatpush3.msra.mxu0 %v6721_v43 }
 0x50e   :  { %5777 = vmatprep.subr.mxu0 %v6723_v33  ;;  %v3994_v35 = vand.u32 4294901760, %v3993_v23  ;;  %v4000_v41 = vsub.f32 %v3998_v19, %v3999_v30 }
 0x50f   :  { %5778 = vmatpush3.msra.mxu0 %v6723_v33 }
 0x510   :  { %5780 = vmatmul.mubr.f32.vlgmr.msra.gmra.mxu0 %v6462_v12  ;;  %5785 = vmatprep.subr.mxu1 %v3994_v35  ;;  %v4001_v10 = vand.u32 4294901760, %v4000_v41  ;;  %v6924_v12 = vld [vmem:[#allocation5_spill] sm:$0xff] }
 0x511   :  { %5799 = vmatprep.subr.mxu0 %v3991_v26  ;;  %5786 = vmatpush3.msra.mxu1 %v3994_v35 }
 0x512   :  { %5800 = vmatpush3.msra.mxu0 %v3991_v26  ;;  %5787 = vmatprep.subr.mxu1 %v4001_v10 }
 0x513   :  { %5801 = vmatprep.subr.mxu0 %v3998_v19  ;;  %5782 = vmatprep.mubr.f32.mxu0 %v6469_v32  ;;  %v6925_v32 = vld [vmem:[#allocation8_spill] sm:$0xff] }
 0x514   :  { %5788 = vmatpush3.msra.mxu1 %v4001_v10  ;;  %5802 = vmatpush3.msra.mxu0 %v3998_v19 }
 0x515   :  { %5783 = vmatmul.mubr.f32.gmra.mxu0 %v6472_v37  ;;  %5789 = vmatprep.subr.mxu1 %v4008_v13  ;;  %v6926_v37 = vld [vmem:[#allocation7_spill] sm:$0xff] }
 0x516   :  { %5803 = vmatprep.subr.mxu0 %v4005_v8  ;;  %5790 = vmatpush3.msra.mxu1 %v4008_v13  ;;  %v71_v13 = vld [vmem:[%s6879_s6] sm:$0xff]  ;;  %s6001_s6 = smov [#allocation2]  }
 0x517   :  { %5804 = vmatpush3.msra.mxu0 %v4005_v8  ;;  %5791 = vmatprep.subr.mxu1 %v4015_v16  ;;  %s4981_s29 = sshll.u32 %s6001_s6, 4  ;;  %s4982_s29 = int_to_ptr.vmem [resolvable:$true] %s4981_s29 }
 0x518   :  { %5805 = vmatprep.subr.mxu0 %v4012_v27  ;;  %5792 = vmatpush3.msra.mxu1 %v4015_v16  ;;  %s5976_s10 = scalar_lea.vmem %s4982_s29, 128  ;;  %p5981_p1 = scmp.lt.s32.totalorder %s4982_s29, %s4982_s29 }
 0x519   :  { %5806 = vmatpush3.msra.mxu0 %v4012_v27  ;;  %5794 = vmatmul.mubr.f32.vlgmr.msra.gmra.mxu1 %v6415_v34  ;;  %p5977_p0 = scmp.ne.s32.totalorder %s4982_s29, %s5976_s10  ;;  %p5982_p2 = scmp.lt.s32.totalorder %s5976_s10, %s5976_s10 }
 0x51a   :  { %5807 = vmatprep.mubr.f32.mxu0 %v6924_v12  ;;  %5813 = vmatprep.subr.mxu1 %v6725_v53  ;;  %v4479_v12 = vsel %vm1339_vm3, %v71_v13, 0 }
 0x51b   :  { %5827 = vmatprep.subr.mxu0 %v3992_v14  ;;  %5808 = vmatmul.mubr.f32.vlgmr.msra.gmra.mxu0 %v6925_v32  ;;  %v6793_v32 = vand.u32 4294901760, %v4479_v12  ;;  %p5983_p3 = por %p5982_p2, %p5981_p1 }
 0x51c   :  { %5814 = vmatpush3.msra.mxu1 %v6725_v53  ;;  %5828 = vmatpush3.msra.mxu0 %v3992_v14 }
 0x51d   :  { %5815 = vmatprep.subr.mxu1 %v6728_v31  ;;  %5829 = vmatprep.subr.mxu0 %v3999_v30  ;;  %p5984_p4 = pnand %p5983_p3, %p5977_p0 }
 0x51e   :  { %5796 = vmatprep.mubr.f32.mxu1 %v6926_v37  ;;  %5816 = vmatpush3.msra.mxu1 %v6728_v31 }
 0x51f   :  { %5830 = vmatpush3.msra.mxu0 %v3999_v30  ;;  %5797 = vmatmul.mubr.f32.gmra.mxu1 %v6927_v63 }
 0x520   :  { %5817 = vmatprep.subr.mxu1 %v6721_v43  ;;  %5831 = vmatprep.subr.mxu0 %v4006_v20 }
 0x521   :  { %5810 = vmatprep.mubr.f32.mxu0 %v6928_v18  ;;  %5818 = vmatpush3.msra.mxu1 %v6721_v43 }
 0x522   :  { %5832 = vmatpush3.msra.mxu0 %v4006_v20  ;;  %5819 = vmatprep.subr.mxu1 %v6723_v33 }
 0x523   :  { %5811 = vmatmul.mubr.f32.gmra.mxu0 %v6929_v46  ;;  %5833 = vmatprep.subr.mxu0 %v4013_v25 }
 0x524   :  { %5820 = vmatpush3.msra.mxu1 %v6723_v33  ;;  %5821 = vmatprep.mubr.f32.mxu1 %v6930_v1 }
 0x525   :  { %5834 = vmatpush3.msra.mxu0 %v4013_v25  ;;  %5822 = vmatmul.mubr.f32.vlgmr.msra.gmra.mxu1 %v6931_v54  ;;  %v6937_v54 = vld [vmem:[#allocation18_spill] sm:$0xff] }
 0x526   :  { %5841 = vmatprep.subr.mxu1 %v6725_v53  ;;  %5835 = vmatprep.mubr.f32.mxu0 %v6379_v58 }
 0x527   :  { %5842 = vmatpush3.msra.mxu1 %v6725_v53  ;;  %5836 = vmatmul.mubr.f32.vlgmr.msra.gmra.mxu0 %v6415_v34 }
 0x528   :  { %5843 = vmatprep.subr.mxu1 %v6728_v31  ;;  %5824 = vmatprep.mubr.f32.mxu1 %v6932_v52 }
 0x529   :  { %5844 = vmatpush3.msra.mxu1 %v6728_v31  ;;  %5838 = vmatprep.mubr.f32.mxu0 %v6926_v37 }
 0x52a   :  { %5825 = vmatmul.mubr.f32.gmra.mxu1 %v6933_v49  ;;  %5845 = vmatprep.subr.mxu1 %v6721_v43 }
 0x52b   :  { %5846 = vmatpush3.msra.mxu1 %v6721_v43  ;;  %5839 = vmatmul.mubr.f32.gmra.mxu0 %v6927_v63 }
 0x52c   :  { %5847 = vmatprep.subr.mxu1 %v6723_v33  ;;  %5849 = vmatprep.mubr.f32.mxu1 %v6379_v58 }
 0x52d   :  { %5848 = vmatpush3.msra.mxu1 %v6723_v33  ;;  %5855 = vmatprep.subr.mxu0 %v5999_v45 }
 0x52e   :  { %5850 = vmatmul.mubr.f32.vlgmr.msra.gmra.mxu1 %v6415_v34  ;;  %5866 = vmatprep.subr.mxu1 %v5999_v45 }
 0x52f   :  { %5852 = vmatprep.mubr.f32.mxu1 %v6926_v37  ;;  %5863 = vmatprep.mubr.msk.f32.mxu0 %vm6000_vm4, %v5999_v45 }
 0x532   :  { %5853 = vmatmul.mubr.f32.gmra.mxu1 %v6927_v63  ;;  %v6796_v63 = vsub.f32 %v4479_v12, %v6793_v32 }
 0x533   :  { %5874 = vmatprep.mubr.msk.f32.mxu1 %vm6000_vm4, %v5999_v45 }
 0x5d0   :  { %v5781_v58 = vpop.f32.mrf.mxu0 }
 0x5d1   :  { %v3942_v24 = vadd.f32 %v5781_v58, %v6934_v9  ;;  %v4552_v58 = vand.u32 4294901760, %v6796_v63 }
 0x5d2   :  { %v3931_v60 = vpop.f32.mrf.mxu0 }
 0x5d3   :  { %v3932_v44 = vadd.f32 %v3931_v60, %v6935_v7  ;;  %v6938_v60 = vld [vmem:[#allocation19_spill] sm:$0xff] }
 0x5d5   :  { %v5784_v38 = vpop.f32.mrf.mxu0 }
 0x5d6   :  { %v3962_v11 = vadd.f32 %v5784_v38, %v6936_v3 }
 0x5d7   :  { %v3951_v34 = vpop.f32.mrf.mxu0 }
 0x5d8   :  { %v3952_v2 = vadd.f32 %v3951_v34, %v6527_v21 }
 0x5d9   :  { %v5795_v42 = vpop.f32.mrf.mxu1 }
 0x5da   :  { %v4059_v57 = vadd.f32 %v5795_v42, %v3942_v24 }
 0x5db   :  { %v4052_v17 = vpop.f32.mrf.mxu1  ;;  %v5809_v59 = vpop.f32.mrf.mxu0 }
 0x5dc   :  { %v4053_v62 = vadd.f32 %v4052_v17, %v3932_v44  ;;  %v4158_v6 = vadd.f32 %v5809_v59, %v4059_v57  ;;  %v6939_v59 = vld [vmem:[#allocation20_spill] sm:$0xff] }
 0x5dd   :  { %v4150_v22 = vpop.f32.mrf.mxu0 }
 0x5de   :  { %v4151_v47 = vadd.f32 %v4150_v22, %v4053_v62 }
 0x5df   :  { %v5798_v50 = vpop.f32.mrf.mxu1 }
 0x5e0   :  { %v4071_v29 = vadd.f32 %v5798_v50, %v3962_v11 }
 0x5e1   :  { %v4064_v39 = vpop.f32.mrf.mxu1 }
 0x5e2   :  { %v4065_v61 = vadd.f32 %v4064_v39, %v3952_v2 }
 0x5e3   :  { %v5812_v0 = vpop.f32.mrf.mxu0 }
 0x5e4   :  { %v4172_v33 = vadd.f32 %v5812_v0, %v4071_v29 }
 0x5e5   :  { %v4164_v55 = vpop.f32.mrf.mxu0  ;;  %v5823_v36 = vpop.f32.mrf.mxu1 }
 0x5e6   :  { %v4257_v15 = vadd.f32 %v5823_v36, %v4158_v6  ;;  %v4165_v31 = vadd.f32 %v4164_v55, %v4065_v61 }
 0x5e7   :  { %v4248_v56 = vpop.f32.mrf.mxu1  ;;  %v5837_v4 = vpop.f32.mrf.mxu0 }
 0x5e8   :  { %v4249_v53 = vadd.f32 %v4248_v56, %v4151_v47  ;;  %v4362_v26 = vadd.f32 %v5837_v4, %v4257_v15 }
 0x5e9   :  { %v4355_v43 = vpop.f32.mrf.mxu0 }
 0x5ea   :  { %v5826_v28 = vpop.f32.mrf.mxu1  ;;  %v4356_v19 = vadd.f32 %v4355_v43, %v4249_v53 }
 0x5eb   :  { %v5840_v8 = vpop.f32.mrf.mxu0  ;;  %v4273_v27 = vadd.f32 %v5826_v28, %v4172_v33 }
 0x5ec   :  { %v4264_v5 = vpop.f32.mrf.mxu1 }
 0x5ed   :  { %v4265_v20 = vadd.f32 %v4264_v5, %v4165_v31  ;;  %v4367_v23 = vpop.f32.mrf.mxu0  ;;  %v4374_v25 = vadd.f32 %v5840_v8, %v4273_v27 }
 0x5ee   :  { %v5851_v14 = vpop.f32.mrf.mxu1 }
 0x5ef   :  { %v4455_v21 = vadd.f32 %v5851_v14, %v4362_v26  ;;  %v4368_v48 = vadd.f32 %v4367_v23, %v4265_v20 }
 0x5f0   :  { %v4448_v30 = vpop.f32.mrf.mxu1 }
 0x5f1   :  { %5967 = vtanh.f32 %v4455_v21  ;;  %v4449_v35 = vadd.f32 %v4448_v30, %v4356_v19  ;;  %v5975_v30 = vld [vmem:[%s6873_s0] sm:$0xff] }
 0x5f2   :  { %v5854_v41 = vpop.f32.mrf.mxu1 }
 0x5f3   :  { %5969 = vtanh.f32 %v4449_v35  ;;  %v4467_v10 = vadd.f32 %v5854_v41, %v4374_v25  ;;  %v4971_v35 = vpop.permute.xlu0 %4970 }
 0x5f4   :  { %v4460_v51 = vpop.f32.mrf.mxu1 }
 0x5f5   :  { %5971 = vtanh.f32 %v4467_v10  ;;  %v4461_v16 = vadd.f32 %v4460_v51, %v4368_v48 }
 0x5f7   :  { %5973 = vtanh.f32 %v4461_v16 }
 0x5fe   :  { %v5968_v37 = vpop.eup %5967 }
 0x5ff   :  { %v4475_v18 = vadd.f32 %v5968_v37, %v6556_v40  ;;  %v4553_v40 = vsub.f32 %v6796_v63, %v4552_v58 }
 0x600   :  { %v5970_v46 = vpop.eup %5969 }
 0x601   :  { %v6799_v1 = vand.u32 4294901760, %v4475_v18  ;;  %v4474_v52 = vadd.f32 %v5970_v46, %v6937_v54  ;;  %v4554_v0 = vand.u32 4294901760, %v4553_v40 }
 0x602   :  { %v5972_v49 = vpop.eup %5971 }
 0x603   :  { %v4477_v38 = vadd.f32 %v5972_v49, %v6938_v60  ;;  %v6804_v34 = vand.u32 4294901760, %v4474_v52  ;;  %v4600_v22 = vsub.f32 %v4475_v18, %v6799_v1 }
 0x604   :  { %v5974_v42 = vpop.eup %5973 }
 0x605   :  { %v6806_v17 = vand.u32 4294901760, %v4477_v38  ;;  %v4476_v50 = vadd.f32 %v5974_v42, %v6939_v59  ;;  %v4607_v39 = vsub.f32 %v4474_v52, %v6804_v34  ;;  %v4601_v57 = vand.u32 4294901760, %v4600_v22 }
 0x607   :  { %5856 = vmatpush3.msra.mxu0 %v6806_v17  ;;  %v4586_v9 = vsub.f32 %v4477_v38, %v6806_v17  ;;  %v6815_v24 = vand.u32 4294901760, %v4476_v50  ;;  %v4608_v62 = vand.u32 4294901760, %v4607_v39  ;;  %v4602_v2 = vsub.f32 %v4600_v22, %v4601_v57 }
 0x608   :  { %5857 = vmatprep.subr.mxu0 %v5999_v45 }
 0x609   :  { %5858 = vmatpush3.msra.mxu0 %v6815_v24  ;;  %v4593_v7 = vsub.f32 %v4476_v50, %v6815_v24  ;;  %v4587_v44 = vand.u32 4294901760, %v4586_v9  ;;  %v4609_v29 = vsub.f32 %v4607_v39, %v4608_v62  ;;  %v4603_v56 = vand.u32 4294901760, %v4602_v2 }
 0x60a   :  { %5859 = vmatprep.subr.mxu0 %v5999_v45 }
 0x60b   :  { %5860 = vmatpush3.msra.mxu0 %v6799_v1  ;;  %v4588_v3 = vsub.f32 %v4586_v9, %v4587_v44  ;;  %v4594_v11 = vand.u32 4294901760, %v4593_v7  ;;  %v4610_v4 = vand.u32 4294901760, %v4609_v29 }
 0x60c   :  { %5861 = vmatprep.subr.mxu0 %v5999_v45 }
 0x60d   :  { %5862 = vmatpush3.msra.mxu0 %v6804_v34  ;;  %v4589_v55 = vand.u32 4294901760, %v4588_v3  ;;  %v4595_v36 = vsub.f32 %v4593_v7, %v4594_v11 }
 0x60e   :  { %5877 = vmatprep.subr.mxu0 %v5999_v45  ;;  %5864 = vmatmul.mubr.f32.vlgmr.msra.gmra.mxu0 %v4554_v0 }
 0x60f   :  { %5867 = vmatpush3.msra.mxu1 %v4589_v55  ;;  %5878 = vmatpush3.msra.mxu0 %v4586_v9  ;;  %v4596_v6 = vand.u32 4294901760, %v4595_v36 }
 0x610   :  { %5868 = vmatprep.subr.mxu1 %v5999_v45  ;;  %5879 = vmatprep.subr.mxu0 %v5999_v45 }
 0x611   :  { %5869 = vmatpush3.msra.mxu1 %v4596_v6  ;;  %5880 = vmatpush3.msra.mxu0 %v4593_v7 }
 0x612   :  { %5870 = vmatprep.subr.mxu1 %v5999_v45  ;;  %5881 = vmatprep.subr.mxu0 %v5999_v45 }
 0x613   :  { %5871 = vmatpush3.msra.mxu1 %v4603_v56  ;;  %5882 = vmatpush3.msra.mxu0 %v4600_v22 }
 0x614   :  { %5872 = vmatprep.subr.mxu1 %v5999_v45  ;;  %5883 = vmatprep.subr.mxu0 %v5999_v45 }
 0x615   :  { %5873 = vmatpush3.msra.mxu1 %v4610_v4  ;;  %5884 = vmatpush3.msra.mxu0 %v4607_v39 }
 0x616   :  { %5875 = vmatmul.mubr.f32.vlgmr.msra.gmra.mxu1 %v6793_v32  ;;  %5885 = vmatprep.mubr.msk.f32.mxu0 %vm6000_vm4, %v5999_v45 }
 0x617   :  { %5888 = vmatprep.subr.mxu1 %v5999_v45  ;;  %5899 = vmatprep.subr.mxu0 %v5999_v45 }
 0x618   :  { %5886 = vmatmul.mubr.f32.vlgmr.msra.gmra.mxu0 %v6796_v63  ;;  %5889 = vmatpush3.msra.mxu1 %v6806_v17 }
 0x619   :  { %5900 = vmatpush3.msra.mxu0 %v4587_v44  ;;  %5890 = vmatprep.subr.mxu1 %v5999_v45 }
 0x61a   :  { %5901 = vmatprep.subr.mxu0 %v5999_v45  ;;  %5891 = vmatpush3.msra.mxu1 %v6815_v24 }
 0x61b   :  { %5902 = vmatpush3.msra.mxu0 %v4594_v11  ;;  %5892 = vmatprep.subr.mxu1 %v5999_v45 }
 0x61c   :  { %5903 = vmatprep.subr.mxu0 %v5999_v45  ;;  %5893 = vmatpush3.msra.mxu1 %v6799_v1 }
 0x61d   :  { %5904 = vmatpush3.msra.mxu0 %v4601_v57  ;;  %5894 = vmatprep.subr.mxu1 %v5999_v45 }
 0x61e   :  { %5905 = vmatprep.subr.mxu0 %v5999_v45  ;;  %5895 = vmatpush3.msra.mxu1 %v6804_v34 }
 0x61f   :  { %5896 = vmatprep.mubr.msk.f32.mxu1 %vm6000_vm4, %v5999_v45  ;;  %5906 = vmatpush3.msra.mxu0 %v4608_v62 }
 0x620   :  { %5897 = vmatmul.mubr.f32.vlgmr.msra.gmra.mxu1 %v4552_v58  ;;  %5910 = vmatprep.subr.mxu1 %v5999_v45 }
 0x621   :  { %5907 = vmatprep.mubr.msk.f32.mxu0 %vm6000_vm4, %v5999_v45  ;;  %5911 = vmatpush3.msra.mxu1 %v6806_v17 }
 0x622   :  { %5908 = vmatmul.mubr.f32.vlgmr.msra.gmra.mxu0 %v6793_v32  ;;  %5912 = vmatprep.subr.mxu1 %v5999_v45 }
 0x623   :  { %5913 = vmatpush3.msra.mxu1 %v6815_v24  ;;  %5918 = vmatprep.mubr.msk.f32.mxu1 %vm6000_vm4, %v5999_v45 }
 0x624   :  { %5914 = vmatprep.subr.mxu1 %v5999_v45 }
 0x625   :  { %5915 = vmatpush3.msra.mxu1 %v6799_v1 }
 0x626   :  { %5916 = vmatprep.subr.mxu1 %v5999_v45 }
 0x627   :  { %5917 = vmatpush3.msra.mxu1 %v6804_v34 }
 0x628   :  { %5919 = vmatmul.mubr.f32.vlgmr.msra.gmra.mxu1 %v6793_v32 }
 0x6ce   :  { %v4556_v47 = vpop.f32.mrf.mxu0 }
 0x6d0   :  { %v5865_v61 = vpop.f32.mrf.mxu0 }
 0x6d6   :  { %v4647_v15 = vpop.f32.mrf.mxu1 }
 0x6d7   :  { %v4648_v53 = vadd.f32 %v4647_v15, %v4556_v47 }
 0x6d8   :  { %v5876_v43 = vpop.f32.mrf.mxu1  ;;  %v4727_v28 = vpop.f32.mrf.mxu0 }
 0x6d9   :  { %v4728_v8 = vadd.f32 %v4727_v28, %v4648_v53 }
 0x6da   :  { %v5887_v33 = vpop.f32.mrf.mxu0 }
 0x6e0   :  { %v4804_v5 = vpop.f32.mrf.mxu1 }
 0x6e1   :  { %v4805_v27 = vadd.f32 %v4804_v5, %v4728_v8 }
 0x6e2   :  { %v5898_v31 = vpop.f32.mrf.mxu1  ;;  %v4887_v26 = vpop.f32.mrf.mxu0 }
 0x6e3   :  { %v4888_v19 = vadd.f32 %v4887_v26, %v4805_v27 }
 0x6e4   :  { %v5909_v14 = vpop.f32.mrf.mxu0 }
 0x6e8   :  { %v4962_v20 = vpop.f32.mrf.mxu1 }
 0x6e9   :  { %v4963_v45 = vadd.f32 %v4962_v20, %v4888_v19 }
 0x6ea   :  { %v5920_v21 = vpop.f32.mrf.mxu1 }
 0x6eb   :  { %v4966_v23 = vmul.f32 0.5, %v4963_v45 }
 0x6ed   :  { %v4967_v25 = vadd.f32 %v5975_v30, %v4966_v23 }
 0x6ef   :  { %v4973_v41 = vadd.f32 %v4971_v35, %v4967_v25 }
 0x6f1   :  { %4974 = vst.msk [vmem:[#allocation2] sm:$0xff] %vm747_vm2, %v4973_v41 }
 0x6f2   :  { %5987 = shalt.err (!%p5984_p4)
}
 0x6f3   :  { %4984 = dma.vmem_to_hbm [thread:$0]  %s4982_s29, 128, %s6881_s8, [#allocation3]  }
 0x6f4   :  { %5996 = dma.done.wait [#allocation3], 128  }
 0x6f5   :  { %5997 = vsyncadd [#allocation3], 4294967168 }
 0x6f6   :  { %4988 = vsyncpa [#allocation3], 1 }

</bundles_post_ra>
